<compile_context>
chip_gen: v7x
topology: tpu7x:2x2x1
jax: 0.10.0
libtpu: 0.0.40
codegen_flags: <defaults>
</compile_context>

<pallas_src>
import functools

import jax
import jax.numpy as jnp
from jax import lax
from jax.experimental import pallas as pl
from jax.experimental.pallas import tpu as pltpu

_LN_EPS = 1e-5
_NORM_EPS = 1e-12            # torch F.normalize default eps
_VMEM_LIMIT = 32 * 1024 * 1024   # safe on v5e/v6e/v7x; tiles below are sized well under it


# ----------------------------------------------------------------------------
# Tile-size helpers (keep blocks (8,128)-aligned and evenly dividing the array)
# ----------------------------------------------------------------------------
def _row_tile(m, pref):
    """Largest multiple-of-8 divisor of m that is <= pref (else m)."""
    if m <= pref:
        return m
    t = pref - (pref % 8)
    while t >= 8:
        if m % t == 0:
            return t
        t -= 8
    return m


def _lane_tile(n, pref):
    """Largest multiple-of-128 divisor of n that is <= pref (else n)."""
    if n <= pref:
        return n
    t = (pref // 128) * 128
    while t >= 128:
        if n % t == 0:
            return t
        t -= 128
    return n


# ----------------------------------------------------------------------------
# Pallas kernels
# ----------------------------------------------------------------------------
def _matmul_bias_kernel(x_ref, w_ref, b_ref, o_ref, acc_ref):
    # (tm, tk) @ (tk, tn) accumulated in f32 over the K grid axis, bias added
    # and the output written only on the last K step.
    k = pl.program_id(2)

    @pl.when(k == 0)
    def _():
        acc_ref[...] = jnp.zeros_like(acc_ref)

    acc_ref[...] += jnp.dot(x_ref[...], w_ref[...],
                            preferred_element_type=jnp.float32)

    @pl.when(k == pl.num_programs(2) - 1)
    def _():
        o_ref[...] = (acc_ref[...] + b_ref[...]).astype(o_ref.dtype)


def pallas_linear(x, w, b, *, out_dtype=jnp.bfloat16, tm=256, tn=256, tk=512):
    """Tiled y = x @ w + b with bf16 operands and f32 accumulation."""
    M, K = x.shape
    K2, N = w.shape
    assert K == K2
    tm = _row_tile(M, tm)
    tn = _lane_tile(N, tn)
    tk = _lane_tile(K, tk)
    grid = (M // tm, N // tn, K // tk)

    flops = 2 * M * N * K
    bytes_accessed = (M * K * 2 + K * N * 2 + N * 4
                      + M * N * jnp.dtype(out_dtype).itemsize)

    return pl.pallas_call(
        _matmul_bias_kernel,
        out_shape=jax.ShapeDtypeStruct((M, N), out_dtype),
        grid_spec=pltpu.PrefetchScalarGridSpec(
            num_scalar_prefetch=0,
            grid=grid,
            in_specs=[
                pl.BlockSpec((tm, tk), lambda i, j, k: (i, k)),
                pl.BlockSpec((tk, tn), lambda i, j, k: (k, j)),
                pl.BlockSpec((1, tn), lambda i, j, k: (0, j)),
            ],
            out_specs=pl.BlockSpec((tm, tn), lambda i, j, k: (i, j)),
            scratch_shapes=[pltpu.VMEM((tm, tn), jnp.float32)],
        ),
        compiler_params=pltpu.CompilerParams(
            dimension_semantics=("parallel", "parallel", "arbitrary"),
            vmem_limit_bytes=_VMEM_LIMIT,
        ),
        cost_estimate=pl.CostEstimate(
            flops=flops, transcendentals=0, bytes_accessed=bytes_accessed),
    )(x.astype(jnp.bfloat16), w.astype(jnp.bfloat16),
      b.reshape(1, N).astype(jnp.float32))


def _matmul_bias_ln_kernel(x_ref, w_ref, b_ref, g_ref, beta_ref, o_ref, acc_ref):
    # Fused (x @ w + b) followed by LayerNorm over the (full, untiled) N axis.
    # f32 accumulator; one-pass mean / mean-of-squares; rsqrt on the EUP.
    k = pl.program_id(1)

    @pl.when(k == 0)
    def _():
        acc_ref[...] = jnp.zeros_like(acc_ref)

    acc_ref[...] += jnp.dot(x_ref[...], w_ref[...],
                            preferred_element_type=jnp.float32)

    @pl.when(k == pl.num_programs(1) - 1)
    def _():
        h = acc_ref[...] + b_ref[...]
        mu = jnp.mean(h, axis=-1, keepdims=True)
        var = jnp.maximum(jnp.mean(h * h, axis=-1, keepdims=True) - mu * mu, 0.0)
        xhat = (h - mu) * lax.rsqrt(var + _LN_EPS)
        o_ref[...] = (xhat * g_ref[...] + beta_ref[...]).astype(o_ref.dtype)


def pallas_linear_layernorm(x, w, b, gamma, beta, *,
                            out_dtype=jnp.bfloat16, tm=256, tk=512):
    """Fused LayerNorm(x @ w + b) — N kept whole so the row stats are exact."""
    M, K = x.shape
    K2, N = w.shape
    assert K == K2
    tm = _row_tile(M, tm)
    tk = _lane_tile(K, tk)
    grid = (M // tm, K // tk)

    flops = 2 * M * N * K + 8 * M * N
    bytes_accessed = (M * K * 2 + K * N * 2 + 3 * N * 4
                      + M * N * jnp.dtype(out_dtype).itemsize)

    return pl.pallas_call(
        _matmul_bias_ln_kernel,
        out_shape=jax.ShapeDtypeStruct((M, N), out_dtype),
        grid_spec=pltpu.PrefetchScalarGridSpec(
            num_scalar_prefetch=0,
            grid=grid,
            in_specs=[
                pl.BlockSpec((tm, tk), lambda i, k: (i, k)),
                pl.BlockSpec((tk, N), lambda i, k: (k, 0)),
                pl.BlockSpec((1, N), lambda i, k: (0, 0)),
                pl.BlockSpec((1, N), lambda i, k: (0, 0)),
                pl.BlockSpec((1, N), lambda i, k: (0, 0)),
            ],
            out_specs=pl.BlockSpec((tm, N), lambda i, k: (i, 0)),
            scratch_shapes=[pltpu.VMEM((tm, N), jnp.float32)],
        ),
        compiler_params=pltpu.CompilerParams(
            dimension_semantics=("parallel", "arbitrary"),
            vmem_limit_bytes=_VMEM_LIMIT,
        ),
        cost_estimate=pl.CostEstimate(
            flops=flops, transcendentals=M, bytes_accessed=bytes_accessed),
    )(x.astype(jnp.bfloat16), w.astype(jnp.bfloat16),
      b.reshape(1, N).astype(jnp.float32),
      gamma.reshape(1, N).astype(jnp.float32),
      beta.reshape(1, N).astype(jnp.float32))


def _layernorm_kernel(x_ref, g_ref, b_ref, o_ref):
    x = x_ref[...].astype(jnp.float32)
    mu = jnp.mean(x, axis=-1, keepdims=True)
    var = jnp.maximum(jnp.mean(x * x, axis=-1, keepdims=True) - mu * mu, 0.0)
    xhat = (x - mu) * lax.rsqrt(var + _LN_EPS)
    o_ref[...] = (xhat * g_ref[...] + b_ref[...]).astype(o_ref.dtype)


def pallas_layernorm(x, gamma, beta, *, out_dtype=jnp.bfloat16, tm=256):
    """Row-tiled LayerNorm; stats computed in f32 regardless of input dtype."""
    M, D = x.shape
    tm = _row_tile(M, tm)
    grid = (M // tm,)
    bytes_accessed = (M * D * (x.dtype.itemsize + jnp.dtype(out_dtype).itemsize)
                      + 2 * D * 4)
    return pl.pallas_call(
        _layernorm_kernel,
        out_shape=jax.ShapeDtypeStruct((M, D), out_dtype),
        grid=grid,
        in_specs=[
            pl.BlockSpec((tm, D), lambda i: (i, 0)),
            pl.BlockSpec((1, D), lambda i: (0, 0)),
            pl.BlockSpec((1, D), lambda i: (0, 0)),
        ],
        out_specs=pl.BlockSpec((tm, D), lambda i: (i, 0)),
        compiler_params=pltpu.CompilerParams(
            dimension_semantics=("parallel",),
            vmem_limit_bytes=_VMEM_LIMIT,
        ),
        cost_estimate=pl.CostEstimate(
            flops=8 * M * D, transcendentals=M, bytes_accessed=bytes_accessed),
    )(x, gamma.reshape(1, D).astype(jnp.float32),
      beta.reshape(1, D).astype(jnp.float32))


def _clip_head_kernel(img_ref, txt_ref, wv_ref, bv_ref, wt_ref, bt_ref,
                      temp_ref, loss_ref):
    # temp.clamp_(0.001, 0.5); scalar lives in SMEM.
    temp = jnp.clip(temp_ref[0], 0.001, 0.5)
    inv_temp = 1.0 / temp

    # vision_proj / text_proj  (bf16 operands, f32 accumulation).
    img = jnp.dot(img_ref[...], wv_ref[...],
                  preferred_element_type=jnp.float32) + bv_ref[...]
    txt = jnp.dot(txt_ref[...], wt_ref[...],
                  preferred_element_type=jnp.float32) + bt_ref[...]

    # F.normalize(..., dim=-1): x * rsqrt(max(sum(x^2), eps^2)) == x / max(||x||, eps)
    img_ss = jnp.sum(img * img, axis=-1, keepdims=True)
    img_feat = img * lax.rsqrt(jnp.maximum(img_ss, _NORM_EPS * _NORM_EPS))
    txt_ss = jnp.sum(txt * txt, axis=-1, keepdims=True)
    txt_feat = txt * lax.rsqrt(jnp.maximum(txt_ss, _NORM_EPS * _NORM_EPS))

    # Fold 1/temp into the image features; compute ONLY sim_i2t.
    # sim_t2i == sim_i2t^T, so its row log-softmax is a column LSE of sim.
    img_scaled = img_feat * inv_temp
    dn = (((1,), (1,)), ((), ()))
    sim = lax.dot_general(img_scaled, txt_feat, dn,
                          preferred_element_type=jnp.float32)   # (B, B)

    B = sim.shape[0]
    row = lax.broadcasted_iota(jnp.int32, (B, B), 0)
    col = lax.broadcasted_iota(jnp.int32, (B, B), 1)
    eye = (row == col).astype(jnp.float32)

    m_r = jnp.max(sim, axis=1, keepdims=True)
    lse_r = jnp.log(jnp.sum(jnp.exp(sim - m_r), axis=1, keepdims=True)) + m_r   # (B,1)
    m_c = jnp.max(sim, axis=0, keepdims=True)
    lse_c = jnp.log(jnp.sum(jnp.exp(sim - m_c), axis=0, keepdims=True)) + m_c   # (1,B)

    diag = jnp.sum(sim * eye, axis=(0, 1), keepdims=True)       # (1,1) = sum_i sim[i,i]
    row_term = jnp.sum(lse_r, axis=0, keepdims=True)            # (1,1)
    col_term = jnp.sum(lse_c, axis=1, keepdims=True)            # (1,1)

    # loss_ita = 0.5 * (mean_i(lse_r - diag) + mean_j(lse_c - diag))
    loss_ref[...] = (row_term + col_term - 2.0 * diag) * (0.5 / B)


def clip_head_loss(img_cls, txt_cls, wv, bv, wt, bt, temp):
    B, Dv = img_cls.shape
    _, Dt = txt_cls.shape
    E = wv.shape[1]
    # TODO(synk): for large per-device B, tile over image rows with an online
    # (flash-style) log-sum-exp instead of holding the full (B,B) sim in VMEM.
    return pl.pallas_call(
        _clip_head_kernel,
        out_shape=jax.ShapeDtypeStruct((1, 1), jnp.float32),
        grid=(1,),
        in_specs=[
            pl.BlockSpec((B, Dv), lambda i: (0, 0)),
            pl.BlockSpec((B, Dt), lambda i: (0, 0)),
            pl.BlockSpec((Dv, E), lambda i: (0, 0)),
            pl.BlockSpec((1, E), lambda i: (0, 0)),
            pl.BlockSpec((Dt, E), lambda i: (0, 0)),
            pl.BlockSpec((1, E), lambda i: (0, 0)),
            pl.BlockSpec(memory_space=pltpu.MemorySpace.SMEM),
        ],
        out_specs=pl.BlockSpec((1, 1), lambda i: (0, 0)),
        compiler_params=pltpu.CompilerParams(
            dimension_semantics=("arbitrary",),
            vmem_limit_bytes=_VMEM_LIMIT,
        ),
        cost_estimate=pl.CostEstimate(
            flops=2 * B * E * (Dv + Dt) + 2 * B * B * E + 20 * B * B,
            transcendentals=B * B + 4 * B,
            bytes_accessed=B * (Dv + Dt) * 2 + (Dv + Dt) * E * 2 + 2 * E * 4 + 8),
    )(
        img_cls.astype(jnp.bfloat16),
        txt_cls.astype(jnp.bfloat16),
        wv.astype(jnp.bfloat16),
        bv.reshape(1, E).astype(jnp.float32),
        wt.astype(jnp.bfloat16),
        bt.reshape(1, E).astype(jnp.float32),
        jnp.asarray(temp, jnp.float32).reshape(1,),
    )


# ----------------------------------------------------------------------------
# Synthetic encoders (glue in plain JAX, matmuls / layernorms in Pallas)
# ----------------------------------------------------------------------------
def visual_encoder(image, params):
    # image: (B, C, H, W) NCHW
    B, C, H, W = image.shape
    P = params["patch"]
    nH, nW = H // P, W // P
    N = nH * nW
    # TODO(synk): express the patch extraction through the patch-embed kernel's
    # index_map (or accept NHWC input) to avoid this XLA-side im2col transpose
    # materialization at real image resolutions.
    patches = image.reshape(B, C, nH, P, nW, P)
    patches = patches.transpose(0, 2, 4, 1, 3, 5).reshape(B * N, C * P * P)
    # tm=128 here so the row axis splits into >1 "parallel" grid steps even at
    # small B (shards across the 2 TCs on v7x); raise to 256 at real sizes.
    tokens = pallas_linear(patches, params["w_patch"], params["b_patch"], tm=128)
    Dv = tokens.shape[-1]
    tokens32 = tokens.astype(jnp.float32).reshape(B, N, Dv)
    cls = jnp.mean(tokens32, axis=1, keepdims=True) + params["cls"]     # (B,1,Dv)
    embeds = jnp.concatenate([cls, tokens32], axis=1) + params["pos"]   # (B,N+1,Dv)
    embeds = pallas_layernorm(
        embeds.reshape(-1, Dv).astype(jnp.bfloat16), params["ln_g"], params["ln_b"]
    ).reshape(B, N + 1, Dv)
    return embeds  # image_embeds; [:, 0, :] is the CLS token


def text_encoder(input_ids, attention_mask, params):
    # input_ids: (B, L) int32, attention_mask: (B, L)
    B, L = input_ids.shape
    emb = jnp.take(params["tok_emb"], input_ids, axis=0)                # (B,L,Ht)
    emb = emb + params["pos_emb"][None, :L, :]
    emb = emb * attention_mask[..., None].astype(emb.dtype)
    Ht = emb.shape[-1]
    # dense + LayerNorm fused into one Pallas kernel (saves an HBM round trip).
    hidden = pallas_linear_layernorm(
        emb.reshape(-1, Ht).astype(jnp.bfloat16),
        params["w_dense"], params["b_dense"], params["ln_g"], params["ln_b"])
    return hidden.reshape(B, L, Ht)  # last_hidden_state


def clip_forward(image, input_ids, attention_mask, params):
    image_embeds = visual_encoder(image, params["vision"])
    text_embeds = text_encoder(input_ids, attention_mask, params["text"])
    img_cls = image_embeds[:, 0, :]
    txt_cls = text_embeds[:, 0, :]
    loss = clip_head_loss(
        img_cls, txt_cls,
        params["vision_proj_w"], params["vision_proj_b"],
        params["text_proj_w"], params["text_proj_b"],
        params["temp"],
    )
    return loss[0, 0]  # loss_ita (scalar)


# ----------------------------------------------------------------------------
# Deterministic parameter construction + demo
# ----------------------------------------------------------------------------
def make_params(key, *, C, P, Dv, Ht, V, Lmax, E, N_tokens, temp):
    ks = jax.random.split(key, 12)
    s = 0.02
    return {
        "vision": {
            "patch": P,
            "w_patch": s * jax.random.normal(ks[0], (C * P * P, Dv), jnp.float32),
            "b_patch": jnp.zeros((Dv,), jnp.float32),
            "cls": s * jax.random.normal(ks[1], (1, 1, Dv), jnp.float32),
            "pos": s * jax.random.normal(ks[2], (1, N_tokens + 1, Dv), jnp.float32),
            "ln_g": jnp.ones((Dv,), jnp.float32),
            "ln_b": jnp.zeros((Dv,), jnp.float32),
        },
        "text": {
            "tok_emb": s * jax.random.normal(ks[3], (V, Ht), jnp.float32),
            "pos_emb": s * jax.random.normal(ks[4], (Lmax, Ht), jnp.float32),
            "w_dense": s * jax.random.normal(ks[5], (Ht, Ht), jnp.float32),
            "b_dense": jnp.zeros((Ht,), jnp.float32),
            "ln_g": jnp.ones((Ht,), jnp.float32),
            "ln_b": jnp.zeros((Ht,), jnp.float32),
        },
        "vision_proj_w": s * jax.random.normal(ks[6], (Dv, E), jnp.float32),
        "vision_proj_b": jnp.zeros((E,), jnp.float32),
        "text_proj_w": s * jax.random.normal(ks[7], (Ht, E), jnp.float32),
        "text_proj_b": jnp.zeros((E,), jnp.float32),
        "temp": jnp.asarray(temp, jnp.float32),
    }


if __name__ == "__main__":
    key = jax.random.PRNGKey(0)
    k_img, k_ids, k_prm = jax.random.split(key, 3)

    # small shapes consistent with the module's forward; feature dims are kept
    # at 128 so every block's lane axis is 128-dense.
    B, C, H, W = 16, 4, 16, 16  # NCHW image
    P = 4                       # patch size -> 16 patches
    Dv = 128                    # vision_width (lane-aligned)
    Ht = 128                    # text hidden size (lane-aligned)
    V = 64                      # vocab
    L = 8                       # sequence length
    E = 128                     # embed_dim (shared projection space, lane-aligned)
    temp = 0.07

    image = jax.random.normal(k_img, (B, C, H, W), jnp.float32)
    input_ids = jax.random.randint(k_ids, (B, L), 0, V, jnp.int32)
    attention_mask = jnp.ones((B, L), jnp.float32)

    params = make_params(
        k_prm, C=C, P=P, Dv=Dv, Ht=Ht, V=V, Lmax=L, E=E,
        N_tokens=(H // P) * (W // P), temp=temp,
    )

    loss_ita = jax.jit(functools.partial(clip_forward, params=params))(
        image, input_ids, attention_mask
    )
    jax.block_until_ready(loss_ita)
    assert loss_ita.shape == () and jnp.isfinite(loss_ita)
    print("KERNEL_OK")
</pallas_src>

<mosaic_0001>
module attributes {stable_mosaic.version = 11 : i64} {
  func.func @_matmul_bias_kernel(%arg0: i32, %arg1: i32, %arg2: i32, %arg3: memref<128x64xbf16, #tpu.memory_space<vmem>>, %arg4: memref<64x128xbf16, #tpu.memory_space<vmem>>, %arg5: memref<1x128xf32, #tpu.memory_space<vmem>>, %arg6: memref<128x128xbf16, #tpu.memory_space<vmem>>, %arg7: memref<128x128xf32, #tpu.memory_space<vmem>>) attributes {dimension_semantics = [#tpu.dimension_semantics<parallel>, #tpu.dimension_semantics<parallel>, #tpu.dimension_semantics<arbitrary>], iteration_bounds = array<i64: 2, 1, 1>, scalar_prefetch = 0 : i64, scratch_operands = 1 : i64, tpu.core_type = #tpu.core_type<tc>, window_params = [{transform_indices = @transform_0, window_bounds = array<i64: 128, 64>}, {transform_indices = @transform_1, window_bounds = array<i64: 64, 128>}, {transform_indices = @transform_2, window_bounds = array<i64: 1, 128>}, {transform_indices = @transform_3, window_bounds = array<i64: 128, 128>}]} {
    %c0_i32 = arith.constant 0 : i32
    %0 = arith.cmpi eq, %arg2, %c0_i32 : i32
    %1 = arith.extui %0 : i1 to i32
    %c0_i32_0 = arith.constant 0 : i32
    %2 = arith.cmpi ne, %1, %c0_i32_0 : i32
    scf.if %2 {
      %cst_10 = arith.constant 0.000000e+00 : f32
      %12 = vector.broadcast %cst_10 : f32 to vector<128x128xf32>
      %c0_11 = arith.constant 0 : index
      %c0_12 = arith.constant 0 : index
      %13 = vector.load %arg7[%c0_11, %c0_12] : memref<128x128xf32, #tpu.memory_space<vmem>>, vector<128x128xf32>
      tpu.vector_store %arg7[%c0_11, %c0_12], %12 {strides = array<i32>} : memref<128x128xf32, #tpu.memory_space<vmem>>, vector<128x128xf32>,
    } else {
    }
    %c0 = arith.constant 0 : index
    %c0_1 = arith.constant 0 : index
    %3 = vector.load %arg7[%c0, %c0_1] : memref<128x128xf32, #tpu.memory_space<vmem>>, vector<128x128xf32>
    %c0_2 = arith.constant 0 : index
    %c0_3 = arith.constant 0 : index
    %4 = vector.load %arg3[%c0_2, %c0_3] : memref<128x64xbf16, #tpu.memory_space<vmem>>, vector<128x64xbf16>
    %c0_4 = arith.constant 0 : index
    %c0_5 = arith.constant 0 : index
    %5 = vector.load %arg4[%c0_4, %c0_5] : memref<64x128xbf16, #tpu.memory_space<vmem>>, vector<64x128xbf16>
    %cst = arith.constant dense<0.000000e+00> : vector<128x128xf32>
    %6 = tpu.matmul %4, %5, %cst {dimension_numbers = #tpu.dot_dimension_numbers<[1], [0], [0], [1], [0, 0, 1, 1], [], []>} : vector<128x64xbf16>, vector<64x128xbf16>, vector<128x128xf32> -> vector<128x128xf32>
    %7 = arith.addf %3, %6 : vector<128x128xf32>
    %c0_6 = arith.constant 0 : index
    %c0_7 = arith.constant 0 : index
    %8 = vector.load %arg7[%c0_6, %c0_7] : memref<128x128xf32, #tpu.memory_space<vmem>>, vector<128x128xf32>
    tpu.vector_store %arg7[%c0_6, %c0_7], %7 {strides = array<i32>} : memref<128x128xf32, #tpu.memory_space<vmem>>, vector<128x128xf32>,
    %c0_i32_8 = arith.constant 0 : i32
    %9 = arith.cmpi eq, %arg2, %c0_i32_8 : i32
    %10 = arith.extui %9 : i1 to i32
    %c0_i32_9 = arith.constant 0 : i32
    %11 = arith.cmpi ne, %10, %c0_i32_9 : i32
    scf.if %11 {
      %c0_10 = arith.constant 0 : index
      %c0_11 = arith.constant 0 : index
      %12 = vector.load %arg7[%c0_10, %c0_11] : memref<128x128xf32, #tpu.memory_space<vmem>>, vector<128x128xf32>
      %c0_12 = arith.constant 0 : index
      %c0_13 = arith.constant 0 : index
      %13 = vector.load %arg5[%c0_12, %c0_13] : memref<1x128xf32, #tpu.memory_space<vmem>>, vector<1x128xf32>
      %14 = vector.broadcast %13 : vector<1x128xf32> to vector<128x128xf32>
      %15 = arith.addf %12, %14 : vector<128x128xf32>
      %16 = arith.truncf %15 : vector<128x128xf32> to vector<128x128xbf16>
      %c0_14 = arith.constant 0 : index
      %c0_15 = arith.constant 0 : index
      %17 = vector.load %arg6[%c0_14, %c0_15] : memref<128x128xbf16, #tpu.memory_space<vmem>>, vector<128x128xbf16>
      tpu.vector_store %arg6[%c0_14, %c0_15], %16 {strides = array<i32>} : memref<128x128xbf16, #tpu.memory_space<vmem>>, vector<128x128xbf16>,
    } else {
    }
    return
  }
  func.func @transform_0(%arg0: i32, %arg1: i32, %arg2: i32) -> (i32, i32) {
    %c0_i32 = arith.constant 0 : i32
    return %arg0, %arg2 : i32, i32
  }
  func.func @transform_1(%arg0: i32, %arg1: i32, %arg2: i32) -> (i32, i32) {
    %c0_i32 = arith.constant 0 : i32
    return %arg2, %arg1 : i32, i32
  }
  func.func @transform_2(%arg0: i32, %arg1: i32, %arg2: i32) -> (i32, i32) {
    %c0_i32 = arith.constant 0 : i32
    %c0_i32_0 = arith.constant 0 : i32
    return %c0_i32, %arg1 : i32, i32
  }
  func.func @transform_3(%arg0: i32, %arg1: i32, %arg2: i32) -> (i32, i32) {
    %c0_i32 = arith.constant 0 : i32
    return %arg0, %arg1 : i32, i32
  }
}

module attributes {stable_mosaic.version = 11 : i64} {
  func.func @_layernorm_kernel(%arg0: i32, %arg1: memref<136x128xbf16, #tpu.memory_space<vmem>>, %arg2: memref<1x128xf32, #tpu.memory_space<vmem>>, %arg3: memref<1x128xf32, #tpu.memory_space<vmem>>, %arg4: memref<136x128xbf16, #tpu.memory_space<vmem>>) attributes {dimension_semantics = [#tpu.dimension_semantics<parallel>], iteration_bounds = array<i64: 2>, scalar_prefetch = 0 : i64, scratch_operands = 0 : i64, tpu.core_type = #tpu.core_type<tc>, window_params = [{transform_indices = @transform_0, window_bounds = array<i64: 136, 128>}, {pipeline_mode = #tpu.pipeline_mode<synchronous>, transform_indices = @transform_1, window_bounds = array<i64: 1, 128>}, {pipeline_mode = #tpu.pipeline_mode<synchronous>, transform_indices = @transform_2, window_bounds = array<i64: 1, 128>}, {transform_indices = @transform_3, window_bounds = array<i64: 136, 128>}]} {
    %c0 = arith.constant 0 : index
    %c0_0 = arith.constant 0 : index
    %0 = vector.load %arg1[%c0, %c0_0] : memref<136x128xbf16, #tpu.memory_space<vmem>>, vector<136x128xbf16>
    %1 = arith.extf %0 : vector<136x128xbf16> to vector<136x128xf32>
    %cst = arith.constant dense<0.000000e+00> : vector<136xf32>
    %2 = vector.multi_reduction <add>, %1, %cst [1] : vector<136x128xf32> to vector<136xf32>
    %3 = vector.shape_cast %2 : vector<136xf32> to vector<136x1xf32>
    %cst_1 = arith.constant 1.280000e+02 : f32
    %4 = vector.broadcast %cst_1 : f32 to vector<136x1xf32>
    %5 = arith.divf %3, %4 : vector<136x1xf32>
    %6 = arith.mulf %1, %1 : vector<136x128xf32>
    %cst_2 = arith.constant dense<0.000000e+00> : vector<136xf32>
    %7 = vector.multi_reduction <add>, %6, %cst_2 [1] : vector<136x128xf32> to vector<136xf32>
    %8 = vector.shape_cast %7 : vector<136xf32> to vector<136x1xf32>
    %cst_3 = arith.constant 1.280000e+02 : f32
    %9 = vector.broadcast %cst_3 : f32 to vector<136x1xf32>
    %10 = arith.divf %8, %9 : vector<136x1xf32>
    %11 = arith.mulf %5, %5 : vector<136x1xf32>
    %12 = arith.subf %10, %11 : vector<136x1xf32>
    %cst_4 = arith.constant 0.000000e+00 : f32
    %13 = vector.broadcast %cst_4 : f32 to vector<136x1xf32>
    %14 = arith.maximumf %12, %13 : vector<136x1xf32>
    %15 = vector.broadcast %5 : vector<136x1xf32> to vector<136x128xf32>
    %16 = arith.subf %1, %15 : vector<136x128xf32>
    %cst_5 = arith.constant 9.99999974E-6 : f32
    %17 = vector.broadcast %cst_5 : f32 to vector<136x1xf32>
    %18 = arith.addf %14, %17 : vector<136x1xf32>
    %19 = math.rsqrt %18 : vector<136x1xf32>
    %20 = vector.broadcast %19 : vector<136x1xf32> to vector<136x128xf32>
    %21 = arith.mulf %16, %20 : vector<136x128xf32>
    %c0_6 = arith.constant 0 : index
    %c0_7 = arith.constant 0 : index
    %22 = vector.load %arg2[%c0_6, %c0_7] : memref<1x128xf32, #tpu.memory_space<vmem>>, vector<1x128xf32>
    %23 = vector.broadcast %22 : vector<1x128xf32> to vector<136x128xf32>
    %24 = arith.mulf %21, %23 : vector<136x128xf32>
    %c0_8 = arith.constant 0 : index
    %c0_9 = arith.constant 0 : index
    %25 = vector.load %arg3[%c0_8, %c0_9] : memref<1x128xf32, #tpu.memory_space<vmem>>, vector<1x128xf32>
    %26 = vector.broadcast %25 : vector<1x128xf32> to vector<136x128xf32>
    %27 = arith.addf %24, %26 : vector<136x128xf32>
    %28 = arith.truncf %27 : vector<136x128xf32> to vector<136x128xbf16>
    %c0_10 = arith.constant 0 : index
    %c0_11 = arith.constant 0 : index
    %29 = vector.load %arg4[%c0_10, %c0_11] : memref<136x128xbf16, #tpu.memory_space<vmem>>, vector<136x128xbf16>
    tpu.vector_store %arg4[%c0_10, %c0_11], %28 {strides = array<i32>} : memref<136x128xbf16, #tpu.memory_space<vmem>>, vector<136x128xbf16>,
    return
  }
  func.func @transform_0(%arg0: i32) -> (i32, i32) {
    %c0_i32 = arith.constant 0 : i32
    %c0_i32_0 = arith.constant 0 : i32
    return %arg0, %c0_i32 : i32, i32
  }
  func.func @transform_1(%arg0: i32) -> (i32, i32) {
    %c0_i32 = arith.constant 0 : i32
    %c0_i32_0 = arith.constant 0 : i32
    %c0_i32_1 = arith.constant 0 : i32
    return %c0_i32, %c0_i32_0 : i32, i32
  }
  func.func @transform_2(%arg0: i32) -> (i32, i32) {
    %c0_i32 = arith.constant 0 : i32
    %c0_i32_0 = arith.constant 0 : i32
    %c0_i32_1 = arith.constant 0 : i32
    return %c0_i32, %c0_i32_0 : i32, i32
  }
  func.func @transform_3(%arg0: i32) -> (i32, i32) {
    %c0_i32 = arith.constant 0 : i32
    %c0_i32_0 = arith.constant 0 : i32
    return %arg0, %c0_i32 : i32, i32
  }
}

module attributes {stable_mosaic.version = 11 : i64} {
  func.func @_matmul_bias_ln_kernel(%arg0: i32, %arg1: i32, %arg2: memref<128x128xbf16, #tpu.memory_space<vmem>>, %arg3: memref<128x128xbf16, #tpu.memory_space<vmem>>, %arg4: memref<1x128xf32, #tpu.memory_space<vmem>>, %arg5: memref<1x128xf32, #tpu.memory_space<vmem>>, %arg6: memref<1x128xf32, #tpu.memory_space<vmem>>, %arg7: memref<128x128xbf16, #tpu.memory_space<vmem>>, %arg8: memref<128x128xf32, #tpu.memory_space<vmem>>) attributes {dimension_semantics = [#tpu.dimension_semantics<parallel>, #tpu.dimension_semantics<arbitrary>], iteration_bounds = array<i64: 1, 1>, scalar_prefetch = 0 : i64, scratch_operands = 1 : i64, tpu.core_type = #tpu.core_type<tc>, window_params = [{transform_indices = @transform_0, window_bounds = array<i64: 128, 128>}, {transform_indices = @transform_1, window_bounds = array<i64: 128, 128>}, {pipeline_mode = #tpu.pipeline_mode<synchronous>, transform_indices = @transform_2, window_bounds = array<i64: 1, 128>}, {pipeline_mode = #tpu.pipeline_mode<synchronous>, transform_indices = @transform_3, window_bounds = array<i64: 1, 128>}, {pipeline_mode = #tpu.pipeline_mode<synchronous>, transform_indices = @transform_4, window_bounds = array<i64: 1, 128>}, {transform_indices = @transform_5, window_bounds = array<i64: 128, 128>}]} {
    %c0_i32 = arith.constant 0 : i32
    %0 = arith.cmpi eq, %arg1, %c0_i32 : i32
    %1 = arith.extui %0 : i1 to i32
    %c0_i32_0 = arith.constant 0 : i32
    %2 = arith.cmpi ne, %1, %c0_i32_0 : i32
    scf.if %2 {
      %cst_10 = arith.constant 0.000000e+00 : f32
      %12 = vector.broadcast %cst_10 : f32 to vector<128x128xf32>
      %c0_11 = arith.constant 0 : index
      %c0_12 = arith.constant 0 : index
      %13 = vector.load %arg8[%c0_11, %c0_12] : memref<128x128xf32, #tpu.memory_space<vmem>>, vector<128x128xf32>
      tpu.vector_store %arg8[%c0_11, %c0_12], %12 {strides = array<i32>} : memref<128x128xf32, #tpu.memory_space<vmem>>, vector<128x128xf32>,
    } else {
    }
    %c0 = arith.constant 0 : index
    %c0_1 = arith.constant 0 : index
    %3 = vector.load %arg8[%c0, %c0_1] : memref<128x128xf32, #tpu.memory_space<vmem>>, vector<128x128xf32>
    %c0_2 = arith.constant 0 : index
    %c0_3 = arith.constant 0 : index
    %4 = vector.load %arg2[%c0_2, %c0_3] : memref<128x128xbf16, #tpu.memory_space<vmem>>, vector<128x128xbf16>
    %c0_4 = arith.constant 0 : index
    %c0_5 = arith.constant 0 : index
    %5 = vector.load %arg3[%c0_4, %c0_5] : memref<128x128xbf16, #tpu.memory_space<vmem>>, vector<128x128xbf16>
    %cst = arith.constant dense<0.000000e+00> : vector<128x128xf32>
    %6 = tpu.matmul %4, %5, %cst {dimension_numbers = #tpu.dot_dimension_numbers<[1], [0], [0], [1], [0, 0, 1, 1], [], []>} : vector<128x128xbf16>, vector<128x128xbf16>, vector<128x128xf32> -> vector<128x128xf32>
    %7 = arith.addf %3, %6 : vector<128x128xf32>
    %c0_6 = arith.constant 0 : index
    %c0_7 = arith.constant 0 : index
    %8 = vector.load %arg8[%c0_6, %c0_7] : memref<128x128xf32, #tpu.memory_space<vmem>>, vector<128x128xf32>
    tpu.vector_store %arg8[%c0_6, %c0_7], %7 {strides = array<i32>} : memref<128x128xf32, #tpu.memory_space<vmem>>, vector<128x128xf32>,
    %c0_i32_8 = arith.constant 0 : i32
    %9 = arith.cmpi eq, %arg1, %c0_i32_8 : i32
    %10 = arith.extui %9 : i1 to i32
    %c0_i32_9 = arith.constant 0 : i32
    %11 = arith.cmpi ne, %10, %c0_i32_9 : i32
    scf.if %11 {
      %c0_10 = arith.constant 0 : index
      %c0_11 = arith.constant 0 : index
      %12 = vector.load %arg8[%c0_10, %c0_11] : memref<128x128xf32, #tpu.memory_space<vmem>>, vector<128x128xf32>
      %c0_12 = arith.constant 0 : index
      %c0_13 = arith.constant 0 : index
      %13 = vector.load %arg4[%c0_12, %c0_13] : memref<1x128xf32, #tpu.memory_space<vmem>>, vector<1x128xf32>
      %14 = vector.broadcast %13 : vector<1x128xf32> to vector<128x128xf32>
      %15 = arith.addf %12, %14 : vector<128x128xf32>
      %cst_14 = arith.constant dense<0.000000e+00> : vector<128xf32>
      %16 = vector.multi_reduction <add>, %15, %cst_14 [1] : vector<128x128xf32> to vector<128xf32>
      %17 = vector.shape_cast %16 : vector<128xf32> to vector<128x1xf32>
      %cst_15 = arith.constant 1.280000e+02 : f32
      %18 = vector.broadcast %cst_15 : f32 to vector<128x1xf32>
      %19 = arith.divf %17, %18 : vector<128x1xf32>
      %20 = arith.mulf %15, %15 : vector<128x128xf32>
      %cst_16 = arith.constant dense<0.000000e+00> : vector<128xf32>
      %21 = vector.multi_reduction <add>, %20, %cst_16 [1] : vector<128x128xf32> to vector<128xf32>
      %22 = vector.shape_cast %21 : vector<128xf32> to vector<128x1xf32>
      %cst_17 = arith.constant 1.280000e+02 : f32
      %23 = vector.broadcast %cst_17 : f32 to vector<128x1xf32>
      %24 = arith.divf %22, %23 : vector<128x1xf32>
      %25 = arith.mulf %19, %19 : vector<128x1xf32>
      %26 = arith.subf %24, %25 : vector<128x1xf32>
      %cst_18 = arith.constant 0.000000e+00 : f32
      %27 = vector.broadcast %cst_18 : f32 to vector<128x1xf32>
      %28 = arith.maximumf %26, %27 : vector<128x1xf32>
      %29 = vector.broadcast %19 : vector<128x1xf32> to vector<128x128xf32>
      %30 = arith.subf %15, %29 : vector<128x128xf32>
      %cst_19 = arith.constant 9.99999974E-6 : f32
      %31 = vector.broadcast %cst_19 : f32 to vector<128x1xf32>
      %32 = arith.addf %28, %31 : vector<128x1xf32>
      %33 = math.rsqrt %32 : vector<128x1xf32>
      %34 = vector.broadcast %33 : vector<128x1xf32> to vector<128x128xf32>
      %35 = arith.mulf %30, %34 : vector<128x128xf32>
      %c0_20 = arith.constant 0 : index
      %c0_21 = arith.constant 0 : index
      %36 = vector.load %arg5[%c0_20, %c0_21] : memref<1x128xf32, #tpu.memory_space<vmem>>, vector<1x128xf32>
      %37 = vector.broadcast %36 : vector<1x128xf32> to vector<128x128xf32>
      %38 = arith.mulf %35, %37 : vector<128x128xf32>
      %c0_22 = arith.constant 0 : index
      %c0_23 = arith.constant 0 : index
      %39 = vector.load %arg6[%c0_22, %c0_23] : memref<1x128xf32, #tpu.memory_space<vmem>>, vector<1x128xf32>
      %40 = vector.broadcast %39 : vector<1x128xf32> to vector<128x128xf32>
      %41 = arith.addf %38, %40 : vector<128x128xf32>
      %42 = arith.truncf %41 : vector<128x128xf32> to vector<128x128xbf16>
      %c0_24 = arith.constant 0 : index
      %c0_25 = arith.constant 0 : index
      %43 = vector.load %arg7[%c0_24, %c0_25] : memref<128x128xbf16, #tpu.memory_space<vmem>>, vector<128x128xbf16>
      tpu.vector_store %arg7[%c0_24, %c0_25], %42 {strides = array<i32>} : memref<128x128xbf16, #tpu.memory_space<vmem>>, vector<128x128xbf16>,
    } else {
    }
    return
  }
  func.func @transform_0(%arg0: i32, %arg1: i32) -> (i32, i32) {
    %c0_i32 = arith.constant 0 : i32
    return %arg0, %arg1 : i32, i32
  }
  func.func @transform_1(%arg0: i32, %arg1: i32) -> (i32, i32) {
    %c0_i32 = arith.constant 0 : i32
    %c0_i32_0 = arith.constant 0 : i32
    return %arg1, %c0_i32 : i32, i32
  }
  func.func @transform_2(%arg0: i32, %arg1: i32) -> (i32, i32) {
    %c0_i32 = arith.constant 0 : i32
    %c0_i32_0 = arith.constant 0 : i32
    %c0_i32_1 = arith.constant 0 : i32
    return %c0_i32, %c0_i32_0 : i32, i32
  }
  func.func @transform_3(%arg0: i32, %arg1: i32) -> (i32, i32) {
    %c0_i32 = arith.constant 0 : i32
    %c0_i32_0 = arith.constant 0 : i32
    %c0_i32_1 = arith.constant 0 : i32
    return %c0_i32, %c0_i32_0 : i32, i32
  }
  func.func @transform_4(%arg0: i32, %arg1: i32) -> (i32, i32) {
    %c0_i32 = arith.constant 0 : i32
    %c0_i32_0 = arith.constant 0 : i32
    %c0_i32_1 = arith.constant 0 : i32
    return %c0_i32, %c0_i32_0 : i32, i32
  }
  func.func @transform_5(%arg0: i32, %arg1: i32) -> (i32, i32) {
    %c0_i32 = arith.constant 0 : i32
    %c0_i32_0 = arith.constant 0 : i32
    return %arg0, %c0_i32 : i32, i32
  }
}

module attributes {stable_mosaic.version = 11 : i64} {
  func.func @_clip_head_kernel(%arg0: i32, %arg1: memref<16x128xbf16, #tpu.memory_space<vmem>>, %arg2: memref<16x128xbf16, #tpu.memory_space<vmem>>, %arg3: memref<128x128xbf16, #tpu.memory_space<vmem>>, %arg4: memref<1x128xf32, #tpu.memory_space<vmem>>, %arg5: memref<128x128xbf16, #tpu.memory_space<vmem>>, %arg6: memref<1x128xf32, #tpu.memory_space<vmem>>, %arg7: memref<1xf32, #tpu.memory_space<smem>>, %arg8: memref<1x1xf32, #tpu.memory_space<vmem>>) attributes {dimension_semantics = [#tpu.dimension_semantics<arbitrary>], iteration_bounds = array<i64: 1>, scalar_prefetch = 0 : i64, scratch_operands = 0 : i64, tpu.core_type = #tpu.core_type<tc>, window_params = [{pipeline_mode = #tpu.pipeline_mode<synchronous>, transform_indices = @transform_0, window_bounds = array<i64: 16, 128>}, {pipeline_mode = #tpu.pipeline_mode<synchronous>, transform_indices = @transform_1, window_bounds = array<i64: 16, 128>}, {pipeline_mode = #tpu.pipeline_mode<synchronous>, transform_indices = @transform_2, window_bounds = array<i64: 128, 128>}, {pipeline_mode = #tpu.pipeline_mode<synchronous>, transform_indices = @transform_3, window_bounds = array<i64: 1, 128>}, {pipeline_mode = #tpu.pipeline_mode<synchronous>, transform_indices = @transform_4, window_bounds = array<i64: 128, 128>}, {pipeline_mode = #tpu.pipeline_mode<synchronous>, transform_indices = @transform_5, window_bounds = array<i64: 1, 128>}, {transform_indices = @transform_6, window_bounds = array<i64: 1>}, {pipeline_mode = #tpu.pipeline_mode<synchronous>, transform_indices = @transform_7, window_bounds = array<i64: 1, 1>}]} {
    %c0 = arith.constant 0 : index
    %0 = memref.load %arg7[%c0] : memref<1xf32, #tpu.memory_space<smem>>
    %cst = arith.constant 1.000000e-03 : f32
    %cst_0 = arith.constant 5.000000e-01 : f32
    %1 = arith.maximumf %cst, %0 : f32
    %2 = arith.minimumf %cst_0, %1 : f32
    %cst_1 = arith.constant 1.000000e+00 : f32
    %3 = arith.divf %cst_1, %2 : f32
    %c0_2 = arith.constant 0 : index
    %c0_3 = arith.constant 0 : index
    %4 = vector.load %arg1[%c0_2, %c0_3] : memref<16x128xbf16, #tpu.memory_space<vmem>>, vector<16x128xbf16>
    %c0_4 = arith.constant 0 : index
    %c0_5 = arith.constant 0 : index
    %5 = vector.load %arg3[%c0_4, %c0_5] : memref<128x128xbf16, #tpu.memory_space<vmem>>, vector<128x128xbf16>
    %cst_6 = arith.constant dense<0.000000e+00> : vector<16x128xf32>
    %6 = tpu.matmul %4, %5, %cst_6 {dimension_numbers = #tpu.dot_dimension_numbers<[1], [0], [0], [1], [0, 0, 1, 1], [], []>} : vector<16x128xbf16>, vector<128x128xbf16>, vector<16x128xf32> -> vector<16x128xf32>
    %c0_7 = arith.constant 0 : index
    %c0_8 = arith.constant 0 : index
    %7 = vector.load %arg4[%c0_7, %c0_8] : memref<1x128xf32, #tpu.memory_space<vmem>>, vector<1x128xf32>
    %8 = vector.broadcast %7 : vector<1x128xf32> to vector<16x128xf32>
    %9 = arith.addf %6, %8 : vector<16x128xf32>
    %c0_9 = arith.constant 0 : index
    %c0_10 = arith.constant 0 : index
    %10 = vector.load %arg2[%c0_9, %c0_10] : memref<16x128xbf16, #tpu.memory_space<vmem>>, vector<16x128xbf16>
    %c0_11 = arith.constant 0 : index
    %c0_12 = arith.constant 0 : index
    %11 = vector.load %arg5[%c0_11, %c0_12] : memref<128x128xbf16, #tpu.memory_space<vmem>>, vector<128x128xbf16>
    %cst_13 = arith.constant dense<0.000000e+00> : vector<16x128xf32>
    %12 = tpu.matmul %10, %11, %cst_13 {dimension_numbers = #tpu.dot_dimension_numbers<[1], [0], [0], [1], [0, 0, 1, 1], [], []>} : vector<16x128xbf16>, vector<128x128xbf16>, vector<16x128xf32> -> vector<16x128xf32>
    %c0_14 = arith.constant 0 : index
    %c0_15 = arith.constant 0 : index
    %13 = vector.load %arg6[%c0_14, %c0_15] : memref<1x128xf32, #tpu.memory_space<vmem>>, vector<1x128xf32>
    %14 = vector.broadcast %13 : vector<1x128xf32> to vector<16x128xf32>
    %15 = arith.addf %12, %14 : vector<16x128xf32>
    %16 = arith.mulf %9, %9 : vector<16x128xf32>
    %cst_16 = arith.constant dense<0.000000e+00> : vector<16xf32>
    %17 = vector.multi_reduction <add>, %16, %cst_16 [1] : vector<16x128xf32> to vector<16xf32>
    %18 = vector.shape_cast %17 : vector<16xf32> to vector<16x1xf32>
    %cst_17 = arith.constant 1.000000e-24 : f32
    %19 = vector.broadcast %cst_17 : f32 to vector<16x1xf32>
    %20 = arith.maximumf %18, %19 : vector<16x1xf32>
    %21 = math.rsqrt %20 : vector<16x1xf32>
    %22 = vector.broadcast %21 : vector<16x1xf32> to vector<16x128xf32>
    %23 = arith.mulf %9, %22 : vector<16x128xf32>
    %24 = arith.mulf %15, %15 : vector<16x128xf32>
    %cst_18 = arith.constant dense<0.000000e+00> : vector<16xf32>
    %25 = vector.multi_reduction <add>, %24, %cst_18 [1] : vector<16x128xf32> to vector<16xf32>
    %26 = vector.shape_cast %25 : vector<16xf32> to vector<16x1xf32>
    %cst_19 = arith.constant 1.000000e-24 : f32
    %27 = vector.broadcast %cst_19 : f32 to vector<16x1xf32>
    %28 = arith.maximumf %26, %27 : vector<16x1xf32>
    %29 = math.rsqrt %28 : vector<16x1xf32>
    %30 = vector.broadcast %29 : vector<16x1xf32> to vector<16x128xf32>
    %31 = arith.mulf %15, %30 : vector<16x128xf32>
    %32 = vector.broadcast %3 : f32 to vector<16x128xf32>
    %33 = arith.mulf %23, %32 : vector<16x128xf32>
    %cst_20 = arith.constant dense<0.000000e+00> : vector<16x16xf32>
    %34 = tpu.matmul %33, %31, %cst_20 {dimension_numbers = #tpu.dot_dimension_numbers<[1], [1], [0], [0], [0, 0, 1, 0], [], []>} : vector<16x128xf32>, vector<16x128xf32>, vector<16x16xf32> -> vector<16x16xf32>
    %35 = tpu.iota {dimensions = array<i32: 0>} : vector<16x16xi32>
    %36 = tpu.iota {dimensions = array<i32: 1>} : vector<16x16xi32>
    %37 = arith.cmpi eq, %35, %36 : vector<16x16xi32>
    %38 = arith.extui %37 : vector<16x16xi1> to vector<16x16xi32>
    %39 = arith.sitofp %38 : vector<16x16xi32> to vector<16x16xf32>
    %cst_21 = arith.constant dense<0xFF800000> : vector<16xf32>
    %40 = vector.multi_reduction <maximumf>, %34, %cst_21 [1] : vector<16x16xf32> to vector<16xf32>
    %41 = vector.shape_cast %40 : vector<16xf32> to vector<16x1xf32>
    %42 = vector.broadcast %41 : vector<16x1xf32> to vector<16x16xf32>
    %43 = arith.subf %34, %42 : vector<16x16xf32>
    %44 = math.exp %43 : vector<16x16xf32>
    %cst_22 = arith.constant dense<0.000000e+00> : vector<16xf32>
    %45 = vector.multi_reduction <add>, %44, %cst_22 [1] : vector<16x16xf32> to vector<16xf32>
    %46 = vector.shape_cast %45 : vector<16xf32> to vector<16x1xf32>
    %47 = math.log %46 : vector<16x1xf32>
    %48 = arith.addf %47, %41 : vector<16x1xf32>
    %cst_23 = arith.constant dense<0xFF800000> : vector<16xf32>
    %49 = vector.multi_reduction <maximumf>, %34, %cst_23 [0] : vector<16x16xf32> to vector<16xf32>
    %50 = vector.shape_cast %49 : vector<16xf32> to vector<1x16xf32>
    %51 = vector.broadcast %50 : vector<1x16xf32> to vector<16x16xf32>
    %52 = arith.subf %34, %51 : vector<16x16xf32>
    %53 = math.exp %52 : vector<16x16xf32>
    %cst_24 = arith.constant dense<0.000000e+00> : vector<16xf32>
    %54 = vector.multi_reduction <add>, %53, %cst_24 [0] : vector<16x16xf32> to vector<16xf32>
    %55 = vector.shape_cast %54 : vector<16xf32> to vector<1x16xf32>
    %56 = math.log %55 : vector<1x16xf32>
    %57 = arith.addf %56, %50 : vector<1x16xf32>
    %58 = arith.mulf %34, %39 : vector<16x16xf32>
    %59 = vector.shape_cast %58 : vector<16x16xf32> to vector<1x16x16xf32>
    %cst_25 = arith.constant dense<0.000000e+00> : vector<1xf32>
    %60 = vector.multi_reduction <add>, %59, %cst_25 [1, 2] : vector<1x16x16xf32> to vector<1xf32>
    %61 = vector.shape_cast %60 : vector<1xf32> to vector<1x1x1xf32>
    %62 = vector.extract %61[0, 0, 0] : f32 from vector<1x1x1xf32>
    %63 = vector.broadcast %62 : f32 to vector<1x1xf32>
    %cst_26 = arith.constant dense<0.000000e+00> : vector<1xf32>
    %64 = vector.multi_reduction <add>, %48, %cst_26 [0] : vector<16x1xf32> to vector<1xf32>
    %65 = vector.shape_cast %64 : vector<1xf32> to vector<1x1xf32>
    %cst_27 = arith.constant dense<0.000000e+00> : vector<1xf32>
    %66 = vector.multi_reduction <add>, %57, %cst_27 [1] : vector<1x16xf32> to vector<1xf32>
    %67 = vector.shape_cast %66 : vector<1xf32> to vector<1x1xf32>
    %68 = arith.addf %65, %67 : vector<1x1xf32>
    %cst_28 = arith.constant 2.000000e+00 : f32
    %69 = vector.broadcast %cst_28 : f32 to vector<1x1xf32>
    %70 = arith.mulf %69, %63 : vector<1x1xf32>
    %71 = arith.subf %68, %70 : vector<1x1xf32>
    %cst_29 = arith.constant 3.125000e-02 : f32
    %72 = vector.broadcast %cst_29 : f32 to vector<1x1xf32>
    %73 = arith.mulf %71, %72 : vector<1x1xf32>
    %c0_30 = arith.constant 0 : index
    %c0_31 = arith.constant 0 : index
    %74 = vector.load %arg8[%c0_30, %c0_31] : memref<1x1xf32, #tpu.memory_space<vmem>>, vector<1x1xf32>
    tpu.vector_store %arg8[%c0_30, %c0_31], %73 {strides = array<i32>} : memref<1x1xf32, #tpu.memory_space<vmem>>, vector<1x1xf32>,
    return
  }
  func.func @transform_0(%arg0: i32) -> (i32, i32) {
    %c0_i32 = arith.constant 0 : i32
    %c0_i32_0 = arith.constant 0 : i32
    %c0_i32_1 = arith.constant 0 : i32
    return %c0_i32, %c0_i32_0 : i32, i32
  }
  func.func @transform_1(%arg0: i32) -> (i32, i32) {
    %c0_i32 = arith.constant 0 : i32
    %c0_i32_0 = arith.constant 0 : i32
    %c0_i32_1 = arith.constant 0 : i32
    return %c0_i32, %c0_i32_0 : i32, i32
  }
  func.func @transform_2(%arg0: i32) -> (i32, i32) {
    %c0_i32 = arith.constant 0 : i32
    %c0_i32_0 = arith.constant 0 : i32
    %c0_i32_1 = arith.constant 0 : i32
    return %c0_i32, %c0_i32_0 : i32, i32
  }
  func.func @transform_3(%arg0: i32) -> (i32, i32) {
    %c0_i32 = arith.constant 0 : i32
    %c0_i32_0 = arith.constant 0 : i32
    %c0_i32_1 = arith.constant 0 : i32
    return %c0_i32, %c0_i32_0 : i32, i32
  }
  func.func @transform_4(%arg0: i32) -> (i32, i32) {
    %c0_i32 = arith.constant 0 : i32
    %c0_i32_0 = arith.constant 0 : i32
    %c0_i32_1 = arith.constant 0 : i32
    return %c0_i32, %c0_i32_0 : i32, i32
  }
  func.func @transform_5(%arg0: i32) -> (i32, i32) {
    %c0_i32 = arith.constant 0 : i32
    %c0_i32_0 = arith.constant 0 : i32
    %c0_i32_1 = arith.constant 0 : i32
    return %c0_i32, %c0_i32_0 : i32, i32
  }
  func.func @transform_6(%arg0: i32) -> i32 {
    %c0_i32 = arith.constant 0 : i32
    %c0_i32_0 = arith.constant 0 : i32
    return %c0_i32 : i32
  }
  func.func @transform_7(%arg0: i32) -> (i32, i32) {
    %c0_i32 = arith.constant 0 : i32
    %c0_i32_0 = arith.constant 0 : i32
    %c0_i32_1 = arith.constant 0 : i32
    return %c0_i32, %c0_i32_0 : i32, i32
  }
}

</mosaic_0001>

<bundles_post_ra>
// kernel: clip_forward.4
= control target key start
LH: loop header
LB: loop body
LE: loop exit
PB: predicated region body
PF: predicated region fallthrough
CT: control target
= control target key end

     0   :  { %s1008_s12 = smov 0   ;;  %s1010_s13 = smov 0   ;;  %s1081_s0 = inlined_call_operand.vmem [shape: bf16[256,64], index: 0, kind: input, shape index: {}]   ;;  %s1082_s1 = inlined_call_operand.vmem [shape: bf16[64,128], index: 1, kind: input, shape index: {}]   ;;  %s1083_s2 = inlined_call_operand.vmem [shape: f32[1,128], index: 2, kind: input, shape index: {}]   ;;  %s1084_s3 = inlined_call_operand.vmem [shape: bf16[256,128], index: 3, kind: output, shape index: {}]  }
   0x1   :  { %s1012_s14 = smov 0  }
   0x2 LB: > { %s32_s15 = sadd.s32 1, %s982_s13  ;;  %p777_p0 = scmp.ge.s32.totalorder %s986_s14, 1  ;;  %s986_s14 = sphi %s1012_s14, %s13_s14   ;;  %s982_s13 = sphi %s1010_s13, %s1086_s13   ;;  %s978_s12 = sphi %s1008_s12, %s1085_s12  }
   0x3   : > { %p34_p1 = scmp.ge.s32.totalorder %s32_s15, 2  ;;  %p188_p2 = scmp.lt.s32.totalorder %s986_s14, 3 }
   0x5   : > { %s1088_s15 = smov (%p34_p1, %s32_s15), 0  ;;  %p189_p3 = pnand %p777_p0, %p188_p2 }
   0x6   : > { %v952_v0 = vld [vmem:[%s1082_s1] sm:$0xff] (!%p189_p3)   ;;  %s778_s18 = sshll.u32 (!%p189_p3), %s978_s12, 4  ;;  %v953_v1 = vld [vmem:[%s1082_s1 + $0x8] sm:$0xff] (!%p189_p3)   ;;  %v954_v2 = vld [vmem:[%s1082_s1 + $0x10] sm:$0xff] (!%p189_p3)   ;;  %vm384_vm0 = vcmask (!%p189_p3), 523264  }
   0x7   : > { %192 = sbr.rel (%p189_p3) target bundleno = 251 (0xfb), region = 32  ;;  %p230_p4 = scmp.lt.s32.totalorder (!%p189_p3), %s778_s18, 31  ;;  %896 = vmatprep.subr.bf16.mxu0 (!%p189_p3), %v952_v0  ;;  %920 = vmatprep.subr.bf16.mxu1 (!%p189_p3), %v952_v0  ;;  %v955_v3 = vld [vmem:[%s1082_s1 + $0x18] sm:$0xff] (!%p189_p3)   ;;  %v802_v13 = vld [vmem:[%s1083_s2] ss:$0 sm:$0xff] (!%p189_p3) }
   0x8   : > { %897 = vmatpush3.bf16.msra.mxu0 (!%p189_p3), %v952_v0  ;;  %924 = vmatpush3.bf16.msra.mxu1 (!%p189_p3), %v952_v0 }
   0x9   : > { %898 = vmatprep.subr.bf16.mxu0 (!%p189_p3), %v953_v1  ;;  %921 = vmatprep.subr.bf16.mxu1 (!%p189_p3), %v953_v1 }
   0xc   : > { %899 = vmatpush3.bf16.msra.mxu0 (!%p189_p3), %v953_v1  ;;  %925 = vmatpush3.bf16.msra.mxu1 (!%p189_p3), %v953_v1 }
   0xd   : > { %900 = vmatprep.subr.bf16.mxu0 (!%p189_p3), %v954_v2  ;;  %922 = vmatprep.subr.bf16.mxu1 (!%p189_p3), %v954_v2 }
   0xe   : > { %s1090_s18 = smov (!%p230_p4, %s778_s18), 31 }
   0xf   : > { %s779_s23 = sshll.u32 %s1090_s18, 2 }
  0x10   : > { %s236_s28 = scalar_lea.vmem %s1081_s0, %s779_s23  ;;  %901 = vmatpush3.bf16.msra.mxu0 %v954_v2  ;;  %926 = vmatpush3.bf16.msra.mxu1 %v954_v2  ;;  %s1062_s6 = scalar_lea.vmem %s1084_s3, %s779_s23 }
  0x11   : > { %v956_v4 = vld [vmem:[%s236_s28] sm:$0xff]   ;;  %902 = vmatprep.subr.bf16.mxu0 %v955_v3  ;;  %923 = vmatprep.subr.bf16.mxu1 %v955_v3  ;;  %v958_v6 = vld [vmem:[%s236_s28 + $0x8] sm:$0xff]   ;;  %v960_v8 = vld [vmem:[%s236_s28 + $0x10] sm:$0xff]  }
  0x12   : > { %v957_v5 = vld [vmem:[%s236_s28 + $0x20] sm:$0xff]   ;;  %904 = vmatprep.mubr.msk.bf16.mxu0 %vm384_vm0, %v956_v4  ;;  %v959_v7 = vld [vmem:[%s236_s28 + $0x28] sm:$0xff]   ;;  %v961_v9 = vld [vmem:[%s236_s28 + $0x30] sm:$0xff]  }
  0x13   : > { %912 = vmatprep.mubr.msk.bf16.mxu1 %vm384_vm0, %v957_v5  ;;  %v962_v10 = vld [vmem:[%s236_s28 + $0x18] sm:$0xff]  }
  0x14   : > { %903 = vmatpush3.bf16.msra.mxu0 %v955_v3  ;;  %927 = vmatpush3.bf16.msra.mxu1 %v955_v3  ;;  %v963_v11 = vld [vmem:[%s236_s28 + $0x38] sm:$0xff]  }
  0x17   : > { %905 = vmatmul.mubr.msk.bf16.vlgmr.msra.gmra.mrb[0].mxu0 %vm384_vm0, %v958_v6  ;;  %913 = vmatmul.mubr.msk.bf16.vlgmr.msra.gmra.mrb[0].mxu1 %vm384_vm0, %v959_v7 }
  0x18   : > { %908 = vmatprep.mubr.msk.bf16.mxu0 %vm384_vm0, %v960_v8  ;;  %916 = vmatprep.mubr.msk.bf16.mxu1 %vm384_vm0, %v961_v9 }
  0x1f   : > { %909 = vmatmul.mubr.msk.bf16.gmra.mrb[4].mxu0 %vm384_vm0, %v962_v10  ;;  %917 = vmatmul.mubr.msk.bf16.gmra.mrb[4].mxu1 %vm384_vm0, %v963_v11 }
  0xea   : > { %v906_v12 = vpop.f32.mrb[0].mxu0  ;;  %v914_v14 = vpop.f32.mrb[0].mxu1 }
  0xeb   : > { %v443_v15 = vpop.f32.mrb[1].mxu0  ;;  %v475_v16 = vpop.f32.mrb[1].mxu1  ;;  %v566_v19 = vadd.f32 %v906_v12, %v802_v13  ;;  %v574_v20 = vadd.f32 %v914_v14, %v802_v13 }
  0xec   : > { %v907_v17 = vpop.f32.mrb[2].mxu0  ;;  %v915_v18 = vpop.f32.mrb[2].mxu1  ;;  %v564_v25 = vadd.f32 %v802_v13, %v443_v15  ;;  %v572_v26 = vadd.f32 %v802_v13, %v475_v16 }
  0xed   : > { %v567_v21 = vadd.f32 %v907_v17, %v802_v13  ;;  %v575_v22 = vadd.f32 %v915_v18, %v802_v13  ;;  %v446_v23 = vpop.f32.mrb[3].mxu0  ;;  %v478_v24 = vpop.f32.mrb[3].mxu1 }
  0xee   : > { %v565_v27 = vadd.f32 %v802_v13, %v446_v23  ;;  %v573_v28 = vadd.f32 %v802_v13, %v478_v24 }
  0xef   : > { %v845_v29 = vpack.c.bf16 %v567_v21, %v566_v19  ;;  %v865_v30 = vpack.c.bf16 %v575_v22, %v574_v20 }
  0xf0   : > { %v840_v31 = vpack.c.bf16 %v565_v27, %v564_v25  ;;  %v860_v32 = vpack.c.bf16 %v573_v28, %v572_v26 }
  0xf1   : > { %877 = vst [vmem:[%s1062_s6 + $0x8] sm:$0xff] %v845_v29   ;;  %881 = vst [vmem:[%s1062_s6 + $0x28] sm:$0xff] %v865_v30  }
  0xf2   : > { %841 = vst [vmem:[%s1062_s6] sm:$0xff] %v840_v31   ;;  %880 = vst [vmem:[%s1062_s6 + $0x20] sm:$0xff] %v860_v32   ;;  %v910_v33 = vpop.f32.mrb[4].mxu0  ;;  %v918_v34 = vpop.f32.mrb[4].mxu1 }
  0xf3   : > { %v459_v35 = vpop.f32.mrb[5].mxu0  ;;  %v491_v36 = vpop.f32.mrb[5].mxu1  ;;  %v570_v39 = vadd.f32 %v910_v33, %v802_v13  ;;  %v578_v40 = vadd.f32 %v918_v34, %v802_v13 }
  0xf4   : > { %v911_v37 = vpop.f32.mrb[6].mxu0  ;;  %v919_v38 = vpop.f32.mrb[6].mxu1  ;;  %v568_v45 = vadd.f32 %v802_v13, %v459_v35  ;;  %v576_v46 = vadd.f32 %v802_v13, %v491_v36 }
  0xf5   : > { %v571_v41 = vadd.f32 %v911_v37, %v802_v13  ;;  %v579_v42 = vadd.f32 %v919_v38, %v802_v13  ;;  %v462_v43 = vpop.f32.mrb[7].mxu0  ;;  %v494_v44 = vpop.f32.mrb[7].mxu1 }
  0xf6   : > { %v569_v47 = vadd.f32 %v802_v13, %v462_v43  ;;  %v577_v48 = vadd.f32 %v802_v13, %v494_v44 }
  0xf7   : > { %v855_v49 = vpack.c.bf16 %v571_v41, %v570_v39  ;;  %v875_v50 = vpack.c.bf16 %v579_v42, %v578_v40 }
  0xf8   : > { %v850_v51 = vpack.c.bf16 %v569_v47, %v568_v45  ;;  %v870_v52 = vpack.c.bf16 %v577_v48, %v576_v46 }
  0xf9   : > { %879 = vst [vmem:[%s1062_s6 + $0x18] sm:$0xff] %v855_v49   ;;  %883 = vst [vmem:[%s1062_s6 + $0x38] sm:$0xff] %v875_v50  }
  0xfa   : > { %878 = vst [vmem:[%s1062_s6 + $0x10] sm:$0xff] %v850_v51   ;;  %882 = vst [vmem:[%s1062_s6 + $0x30] sm:$0xff] %v870_v52  }
  0xfb PF: > { %s13_s14 = sadd.s32 1, %s986_s14   ;;  %s1085_s12 = smov %s982_s13 }
  0xfc   : > { %p10_p5 = scmp.ge.s32.totalorder %s13_s14, 4   ;;  %s1086_s13 = smov %s1088_s15 }
  0xfe   :  { %12 = sbr.rel (!%p10_p5) target bundleno = 2 (0x2), region = 76 }

// kernel: clip_forward.5
= control target key start
LH: loop header
LB: loop body
LE: loop exit
PB: predicated region body
PF: predicated region fallthrough
CT: control target
= control target key end

     0   :  { %s838_s12 = smov 0   ;;  %s1172_s0 = inlined_call_operand.vmem [shape: bf16[272,128], index: 0, kind: input, shape index: {}]   ;;  %s1173_s1 = inlined_call_operand.vmem [shape: f32[1,128], index: 1, kind: input, shape index: {}]   ;;  %s1174_s2 = inlined_call_operand.vmem [shape: f32[1,128], index: 2, kind: input, shape index: {}]   ;;  %s1175_s3 = inlined_call_operand.vmem [shape: bf16[272,128], index: 3, kind: output, shape index: {}]  }
   0x1 LB: > { %s637_s13 = sadd.s32 4294967295, %s816_s12   ;;  %p641_p0 = scmp.ge.s32.totalorder %s816_s12, 1  ;;  %s816_s12 = sphi %s838_s12, %s13_s12  }
   0x2   : > { %p138_p1 = scmp.lt.s32.totalorder %s816_s12, 3 }
   0x4   : > { %p139_p2 = pnand %p641_p0, %p138_p1 }
   0x5   : > { %s162_s14 = smul.u32 (!%p139_p2), 17, %s637_s13 }
   0x6   : > { %142 = sbr.rel (%p139_p2) target bundleno = 256 (0x100), region = 32 }
   0x7   : > { %p163_p3 = scmp.lt.s32.totalorder (!%p139_p2), %s162_s14, 33 }
   0xd   : > { %s1178_s14 = smov (!%p163_p3, %s162_s14), 33 }
   0xe   : > { %s642_s15 = sshll.u32 %s1178_s14, 2 }
   0xf   : > { %s854_s18 = scalar_lea.vmem %s1172_s0, %s642_s15  ;;  %s1093_s25 = scalar_lea.vmem %s1175_s3, %s642_s15 }
  0x10   : > { %v754_v0 = vld [vmem:[%s854_s18 + $0x8] sm:$0xff]   ;;  %v683_v1 = vld [vmem:[%s854_s18] sm:$0xff]   ;;  %v755_v6 = vld [vmem:[%s854_s18 + $0x10] sm:$0xff]  }
  0x11   : > { %v858_v2 = vunpack.c.l.bf16 %v754_v0  ;;  %v860_v3 = vunpack.c.l.bf16 %v683_v1  ;;  %v864_v4 = vunpack.c.h.bf16 %v754_v0  ;;  %v866_v5 = vunpack.c.h.bf16 %v683_v1  ;;  %v756_v9 = vld [vmem:[%s854_s18 + $0x18] sm:$0xff]   ;;  %v757_v12 = vld [vmem:[%s854_s18 + $0x20] sm:$0xff]   ;;  %v758_v15 = vld [vmem:[%s854_s18 + $0x28] sm:$0xff]  }
  0x12   : > { %v871_v7 = vunpack.c.h.bf16 %v755_v6  ;;  %v873_v8 = vunpack.c.l.bf16 %v755_v6  ;;  %v878_v10 = vunpack.c.h.bf16 %v756_v9  ;;  %v880_v11 = vunpack.c.l.bf16 %v756_v9  ;;  %v759_v18 = vld [vmem:[%s854_s18 + $0x30] sm:$0xff]   ;;  %v760_v21 = vld [vmem:[%s854_s18 + $0x38] sm:$0xff]   ;;  %v190_v24 = vld [vmem:[%s854_s18 + $0x40] sm:$0xf] }
  0x13   : > { %212 = vadd.xlane.f32.xlu1 %v858_v2  ;;  %208 = vadd.xlane.f32.xlu0 %v860_v3  ;;  %v885_v13 = vunpack.c.h.bf16 %v757_v12  ;;  %v887_v14 = vunpack.c.l.bf16 %v757_v12  ;;  %v892_v16 = vunpack.c.h.bf16 %v758_v15  ;;  %v894_v17 = vunpack.c.l.bf16 %v758_v15 }
  0x14   : > { %v899_v19 = vunpack.c.h.bf16 %v759_v18  ;;  %v901_v20 = vunpack.c.l.bf16 %v759_v18  ;;  %v906_v22 = vunpack.c.h.bf16 %v760_v21  ;;  %v908_v23 = vunpack.c.l.bf16 %v760_v21 }
  0x15   : > { %v913_v25 = vunpack.c.l.bf16 %v190_v24  ;;  %v260_v26 = vmul.f32 %v860_v3, %v860_v3  ;;  %v261_v27 = vmul.f32 %v866_v5, %v866_v5  ;;  %v262_v28 = vmul.f32 %v858_v2, %v858_v2 }
  0x16   : > { %v263_v29 = vmul.f32 %v864_v4, %v864_v4  ;;  %v264_v30 = vmul.f32 %v873_v8, %v873_v8  ;;  %v265_v31 = vmul.f32 %v871_v7, %v871_v7  ;;  %v266_v32 = vmul.f32 %v880_v11, %v880_v11 }
  0x17   : > { %214 = vadd.xlane.f32.xlu1 %v864_v4  ;;  %210 = vadd.xlane.f32.xlu0 %v866_v5  ;;  %v267_v33 = vmul.f32 %v878_v10, %v878_v10  ;;  %v268_v34 = vmul.f32 %v887_v14, %v887_v14  ;;  %v269_v35 = vmul.f32 %v885_v13, %v885_v13 }
  0x18   : > { %v270_v36 = vmul.f32 %v894_v17, %v894_v17  ;;  %v271_v37 = vmul.f32 %v892_v16, %v892_v16  ;;  %v272_v38 = vmul.f32 %v901_v20, %v901_v20  ;;  %v273_v39 = vmul.f32 %v899_v19, %v899_v19 }
  0x19   : > { %v274_v40 = vmul.f32 %v908_v23, %v908_v23  ;;  %v275_v41 = vmul.f32 %v906_v22, %v906_v22  ;;  %v276_v42 = vmul.f32 %v913_v25, %v913_v25 }
  0x1b   : > { %218 = vadd.xlane.f32.xlu1 %v871_v7  ;;  %216 = vadd.xlane.f32.xlu0 %v873_v8 }
  0x1f   : > { %222 = vadd.xlane.f32.xlu1 %v878_v10  ;;  %220 = vadd.xlane.f32.xlu0 %v880_v11 }
  0x23   : > { %226 = vadd.xlane.f32.xlu1 %v885_v13  ;;  %224 = vadd.xlane.f32.xlu0 %v887_v14 }
  0x27   : > { %230 = vadd.xlane.f32.xlu1 %v892_v16  ;;  %228 = vadd.xlane.f32.xlu0 %v894_v17 }
  0x2b   : > { %234 = vadd.xlane.f32.xlu1 %v899_v19  ;;  %232 = vadd.xlane.f32.xlu0 %v901_v20 }
  0x2f   : > { %238 = vadd.xlane.f32.xlu1 %v906_v22  ;;  %236 = vadd.xlane.f32.xlu0 %v908_v23 }
  0x33   : > { %240 = vadd.xlane.f32.xlu0 %v913_v25  ;;  %277 = vadd.xlane.f32.xlu1 %v260_v26 }
  0x37   : > { %279 = vadd.xlane.f32.xlu0 %v261_v27  ;;  %281 = vadd.xlane.f32.xlu1 %v262_v28 }
  0x3b   : > { %283 = vadd.xlane.f32.xlu0 %v263_v29  ;;  %285 = vadd.xlane.f32.xlu1 %v264_v30 }
  0x3f   : > { %287 = vadd.xlane.f32.xlu0 %v265_v31  ;;  %289 = vadd.xlane.f32.xlu1 %v266_v32 }
  0x43   : > { %291 = vadd.xlane.f32.xlu0 %v267_v33  ;;  %293 = vadd.xlane.f32.xlu1 %v268_v34 }
  0x47   : > { %295 = vadd.xlane.f32.xlu0 %v269_v35  ;;  %297 = vadd.xlane.f32.xlu1 %v270_v36 }
  0x4b   : > { %299 = vadd.xlane.f32.xlu0 %v271_v37  ;;  %301 = vadd.xlane.f32.xlu1 %v272_v38 }
  0x4f   : > { %303 = vadd.xlane.f32.xlu0 %v273_v39  ;;  %305 = vadd.xlane.f32.xlu1 %v274_v40 }
  0x53   : > { %307 = vadd.xlane.f32.xlu0 %v275_v41  ;;  %309 = vadd.xlane.f32.xlu1 %v276_v42 }
  0xa0   : > { %v213_v43 = vpop.xlane.xlu1 %212  ;;  %v209_v44 = vpop.xlane.xlu0 %208 }
  0xa1   : > { %v960_v59 = vmul.f32 0.0078125, %v209_v44  ;;  %v962_v60 = vmul.f32 0.0078125, %v213_v43 }
  0xa3   : > { %v328_v63 = vmul.f32 %v960_v59, %v960_v59  ;;  %v330_v15 = vmul.f32 %v962_v60, %v962_v60  ;;  %v381_v18 = vsub.f32 %v858_v2, %v962_v60  ;;  %v379_v21 = vsub.f32 %v860_v3, %v960_v59 }
  0xa4   : > { %v215_v45 = vpop.xlane.xlu1 %214  ;;  %v211_v46 = vpop.xlane.xlu0 %210 }
  0xa5   : > { %v968_v0 = vmul.f32 0.0078125, %v211_v46  ;;  %v970_v6 = vmul.f32 0.0078125, %v215_v45 }
  0xa7   : > { %v329_v28 = vmul.f32 %v968_v0, %v968_v0  ;;  %v331_v32 = vmul.f32 %v970_v6, %v970_v6  ;;  %v382_v33 = vsub.f32 %v864_v4, %v970_v6  ;;  %v380_v34 = vsub.f32 %v866_v5, %v968_v0 }
  0xa8   : > { %v219_v47 = vpop.xlane.xlu1 %218  ;;  %v217_v48 = vpop.xlane.xlu0 %216 }
  0xa9   : > { %v972_v9 = vmul.f32 0.0078125, %v219_v47  ;;  %v980_v24 = vmul.f32 0.0078125, %v217_v48 }
  0xab   : > { %v333_v36 = vmul.f32 %v972_v9, %v972_v9  ;;  %v384_v40 = vsub.f32 %v871_v7, %v972_v9  ;;  %v332_v41 = vmul.f32 %v980_v24, %v980_v24  ;;  %v383_v42 = vsub.f32 %v873_v8, %v980_v24 }
  0xac   : > { %v223_v49 = vpop.xlane.xlu1 %222  ;;  %v221_v50 = vpop.xlane.xlu0 %220 }
  0xad   : > { %v990_v35 = vmul.f32 0.0078125, %v223_v49  ;;  %v1000_v43 = vmul.f32 0.0078125, %v221_v50 }
  0xaf   : > { %v335_v49 = vmul.f32 %v990_v35, %v990_v35 }
  0xb0   : > { %v227_v51 = vpop.xlane.xlu1 %226  ;;  %v225_v52 = vpop.xlane.xlu0 %224 }
  0xb4   : > { %v231_v53 = vpop.xlane.xlu1 %230  ;;  %v950_v54 = vpop.xlane.xlu0 %228 }
  0xb8   : > { %v952_v55 = vpop.xlane.xlu1 %234  ;;  %v954_v56 = vpop.xlane.xlu0 %232 }
  0xbc   : > { %v956_v57 = vpop.xlane.xlu1 %238  ;;  %v958_v58 = vpop.xlane.xlu0 %236 }
  0xc0   : > { %v964_v61 = vpop.xlane.xlu0 %240  ;;  %v278_v62 = vpop.xlane.xlu1 %277 }
  0xc1   : > { %v311_v1 = vmul.f32 0.0078125, %v278_v62  ;;  %v1004_v62 = vmul.f32 0.0078125, %v227_v51 }
  0xc3   : > { %v345_v12 = vsub.f32 %v311_v1, %v328_v63  ;;  %v1006_v63 = vmul.f32 0.0078125, %v225_v52 }
  0xc4   : > { %v280_v26 = vpop.xlane.xlu0 %279  ;;  %v282_v27 = vpop.xlane.xlu1 %281 }
  0xc5   : > { %v362_v29 = vmax.f32 %v345_v12, 0.0  ;;  %v312_v30 = vmul.f32 0.0078125, %v280_v26  ;;  %v313_v31 = vmul.f32 0.0078125, %v282_v27  ;;  %v386_v12 = vsub.f32 %v878_v10, %v990_v35 }
  0xc6   : > { %v334_v27 = vmul.f32 %v1000_v43, %v1000_v43 }
  0xc7   : > { %v396_v37 = vadd.f32 1e-05, %v362_v29  ;;  %v346_v38 = vsub.f32 %v312_v30, %v329_v28  ;;  %v347_v39 = vsub.f32 %v313_v31, %v330_v15  ;;  %v385_v28 = vsub.f32 %v880_v11, %v1000_v43 }
  0xc8   : > { %v284_v44 = vpop.xlane.xlu0 %283  ;;  %v286_v45 = vpop.xlane.xlu1 %285  ;;  %v1014_v29 = vmul.f32 0.0078125, %v231_v53 }
  0xc9   : > { %776 = vrsqrt.f32 %v396_v37  ;;  %v363_v46 = vmax.f32 %v346_v38, 0.0  ;;  %v364_v47 = vmax.f32 %v347_v39, 0.0  ;;  %v314_v48 = vmul.f32 0.0078125, %v284_v44 }
  0xca   : > { %v315_v1 = vmul.f32 0.0078125, %v286_v45  ;;  %v337_v39 = vmul.f32 %v1004_v62, %v1004_v62  ;;  %v1021_v45 = vmul.f32 0.0078125, %v950_v54 }
  0xcb   : > { %v397_v15 = vadd.f32 1e-05, %v363_v46  ;;  %v398_v50 = vadd.f32 1e-05, %v364_v47  ;;  %v348_v26 = vsub.f32 %v314_v48, %v331_v32  ;;  %v336_v32 = vmul.f32 %v1006_v63, %v1006_v63 }
  0xcc   : > { %v349_v30 = vsub.f32 %v315_v1, %v332_v41  ;;  %v288_v51 = vpop.xlane.xlu0 %287  ;;  %v290_v31 = vpop.xlane.xlu1 %289  ;;  %v1027_v48 = vmul.f32 %v1014_v29, %v1014_v29  ;;  %v1030_v1 = vmul.f32 0.0078125, %v952_v55  ;;  %v338_v55 = vmul.f32 %v1021_v45, %v1021_v45 }
  0xcd   : > { %778 = vrsqrt.f32 %v397_v15  ;;  %v365_v52 = vmax.f32 %v348_v26, 0.0  ;;  %v316_v37 = vmul.f32 0.0078125, %v288_v51  ;;  %v317_v38 = vmul.f32 0.0078125, %v290_v31 }
  0xce   : > { %780 = vrsqrt.f32 %v398_v50  ;;  %v366_v44 = vmax.f32 %v349_v30, 0.0  ;;  %v389_v35 = vsub.f32 %v894_v17, %v1021_v45  ;;  %v390_v17 = vsub.f32 %v892_v16, %v1014_v29 }
  0xcf   : > { %v399_v53 = vadd.f32 1e-05, %v365_v52  ;;  %v350_v46 = vsub.f32 %v316_v37, %v333_v36  ;;  %v351_v41 = vsub.f32 %v317_v38, %v334_v27  ;;  %v1033_v36 = vmul.f32 0.0078125, %v954_v56  ;;  %v1050_v56 = vld [vmem:[%s1173_s1] ss:$0 sm:$0xff] }
  0xd0   : > { %v400_v15 = vadd.f32 1e-05, %v366_v44  ;;  %v292_v26 = vpop.xlane.xlu0 %291  ;;  %v294_v50 = vpop.xlane.xlu1 %293  ;;  %v1036_v27 = vmul.f32 0.0078125, %v956_v57 }
  0xd1   : > { %782 = vrsqrt.f32 %v399_v53  ;;  %v367_v30 = vmax.f32 %v350_v46, 0.0  ;;  %v368_v54 = vmax.f32 %v351_v41, 0.0  ;;  %v318_v51 = vmul.f32 0.0078125, %v292_v26 }
  0xd2   : > { %784 = vrsqrt.f32 %v400_v15  ;;  %v319_v31 = vmul.f32 0.0078125, %v294_v50  ;;  %v1042_v53 = vmul.f32 %v1030_v1, %v1030_v1  ;;  %v1045_v46 = vmul.f32 0.0078125, %v958_v58 }
  0xd3   : > { %v777_v52 = vpop.eup %776  ;;  %v401_v37 = vadd.f32 1e-05, %v367_v30  ;;  %v402_v38 = vadd.f32 1e-05, %v368_v54  ;;  %v352_v44 = vsub.f32 %v318_v51, %v335_v49  ;;  %v340_v58 = vmul.f32 %v1033_v36, %v1033_v36 }
  0xd4   : > { %v430_v57 = vmul.f32 %v777_v52, %v379_v21  ;;  %v353_v41 = vsub.f32 %v319_v31, %v336_v32  ;;  %v296_v15 = vpop.xlane.xlu0 %295  ;;  %v298_v26 = vpop.xlane.xlu1 %297  ;;  %v1059_v54 = vmul.f32 %v1036_v27, %v1036_v27  ;;  %v1064_v52 = vmul.f32 %v1045_v46, %v1045_v46 }
  0xd5   : > { %786 = vrsqrt.f32 %v401_v37  ;;  %v369_v49 = vmax.f32 %v352_v44, 0.0  ;;  %v320_v50 = vmul.f32 0.0078125, %v296_v15  ;;  %v321_v30 = vmul.f32 0.0078125, %v298_v26  ;;  %v1072_v44 = vld [vmem:[%s1174_s2] ss:$0 sm:$0xff] }
  0xd6   : > { %788 = vrsqrt.f32 %v402_v38  ;;  %v370_v51 = vmax.f32 %v353_v41, 0.0  ;;  %v454_v3 = vmul.f32 %v1050_v56, %v430_v57  ;;  %v1067_v37 = vmul.f32 0.0078125, %v964_v61 }
  0xd7   : > { %v779_v47 = vpop.eup %778  ;;  %v403_v59 = vadd.f32 1e-05, %v369_v49  ;;  %v354_v21 = vsub.f32 %v320_v50, %v337_v39  ;;  %v355_v32 = vsub.f32 %v321_v30, %v338_v55 }
  0xd8   : > { %v781_v31 = vpop.eup %780  ;;  %v431_v38 = vmul.f32 %v779_v47, %v380_v34  ;;  %v404_v57 = vadd.f32 1e-05, %v370_v51  ;;  %v300_v39 = vpop.xlane.xlu0 %299  ;;  %v478_v5 = vadd.f32 %v1072_v44, %v454_v3  ;;  %v344_v3 = vmul.f32 %v1067_v37, %v1067_v37 }
  0xd9   : > { %v302_v55 = vpop.xlane.xlu1 %301  ;;  %v432_v41 = vmul.f32 %v781_v31, %v381_v18  ;;  %790 = vrsqrt.f32 %v403_v59  ;;  %v371_v15 = vmax.f32 %v354_v21, 0.0  ;;  %v372_v61 = vmax.f32 %v355_v32, 0.0 }
  0xda   : > { %v455_v26 = vmul.f32 %v1050_v56, %v431_v38  ;;  %792 = vrsqrt.f32 %v404_v57  ;;  %v322_v49 = vmul.f32 0.0078125, %v300_v39  ;;  %v323_v50 = vmul.f32 0.0078125, %v302_v55 }
  0xdb   : > { %v783_v30 = vpop.eup %782  ;;  %v456_v0 = vmul.f32 %v1050_v56, %v432_v41  ;;  %v405_v34 = vadd.f32 1e-05, %v371_v15  ;;  %v406_v47 = vadd.f32 1e-05, %v372_v61 }
  0xdc   : > { %v785_v51 = vpop.eup %784  ;;  %v479_v2 = vadd.f32 %v1072_v44, %v455_v26  ;;  %v433_v60 = vmul.f32 %v783_v30, %v382_v33  ;;  %v356_v18 = vsub.f32 %v322_v49, %v1027_v48  ;;  %v357_v59 = vsub.f32 %v323_v50, %v340_v58  ;;  %v304_v21 = vpop.xlane.xlu0 %303 }
  0xdd   : > { %v306_v32 = vpop.xlane.xlu1 %305  ;;  %v434_v4 = vmul.f32 %v785_v51, %v383_v42  ;;  %794 = vrsqrt.f32 %v405_v34  ;;  %v324_v6 = vmul.f32 0.0078125, %v304_v21  ;;  %v480_v15 = vadd.f32 %v1072_v44, %v456_v0 }
  0xde   : > { %v717_v33 = vpack.c.bf16 %v479_v2, %v478_v5  ;;  %v457_v48 = vmul.f32 %v1050_v56, %v433_v60  ;;  %796 = vrsqrt.f32 %v406_v47  ;;  %v373_v58 = vmax.f32 %v356_v18, 0.0 }
  0xdf   : > { %v787_v31 = vpop.eup %786  ;;  %v458_v38 = vmul.f32 %v1050_v56, %v434_v4  ;;  %v374_v57 = vmax.f32 %v357_v59, 0.0  ;;  %v358_v39 = vsub.f32 %v324_v6, %v1042_v53  ;;  %v325_v55 = vmul.f32 0.0078125, %v306_v32 }
  0xe0   : > { %v789_v41 = vpop.eup %788  ;;  %718 = vst [vmem:[%s1093_s25] sm:$0xff] %v717_v33   ;;  %v481_v8 = vadd.f32 %v1072_v44, %v457_v48  ;;  %v435_v24 = vmul.f32 %v787_v31, %v384_v40  ;;  %v407_v42 = vadd.f32 1e-05, %v373_v58  ;;  %v308_v61 = vpop.xlane.xlu0 %307  ;;  %v1176_v60 = vsub.f32 %v887_v14, %v1006_v63 }
  0xe1   : > { %v482_v26 = vadd.f32 %v1072_v44, %v458_v38  ;;  %v436_v53 = vmul.f32 %v789_v41, %v385_v28  ;;  %v408_v49 = vadd.f32 1e-05, %v374_v57  ;;  %v375_v50 = vmax.f32 %v358_v39, 0.0  ;;  %v310_v30 = vpop.xlane.xlu1 %309 }
  0xe2   : > { %v722_v5 = vpack.c.bf16 %v481_v8, %v480_v15  ;;  %v459_v0 = vmul.f32 %v1050_v56, %v435_v24  ;;  %798 = vrsqrt.f32 %v407_v42  ;;  %v359_v34 = vsub.f32 %v325_v55, %v1064_v52 }
  0xe3   : > { %v791_v7 = vpop.eup %790  ;;  %v460_v9 = vmul.f32 %v1050_v56, %v436_v53  ;;  %800 = vrsqrt.f32 %v408_v49  ;;  %v409_v40 = vadd.f32 1e-05, %v375_v50  ;;  %v326_v47 = vmul.f32 0.0078125, %v308_v61 }
  0xe4   : > { %v793_v51 = vpop.eup %792  ;;  %761 = vst [vmem:[%s1093_s25 + $0x8] sm:$0xff] %v722_v5   ;;  %v483_v11 = vadd.f32 %v1072_v44, %v459_v0  ;;  %v437_v43 = vmul.f32 %v791_v7, %v386_v12  ;;  %v376_v28 = vmax.f32 %v359_v34, 0.0  ;;  %v327_v2 = vmul.f32 0.0078125, %v310_v30 }
  0xe5   : > { %v388_v52 = vsub.f32 %v885_v13, %v1004_v62  ;;  %v438_v18 = vmul.f32 %v793_v51, %v1176_v60  ;;  %802 = vrsqrt.f32 %v409_v40  ;;  %v360_v59 = vsub.f32 %v326_v47, %v1059_v54 }
  0xe6   : > { %v727_v21 = vpack.c.bf16 %v483_v11, %v482_v26  ;;  %v461_v32 = vmul.f32 %v1050_v56, %v437_v43  ;;  %v410_v4 = vadd.f32 1e-05, %v376_v28  ;;  %v361_v6 = vsub.f32 %v327_v2, %v344_v3 }
  0xe7   : > { %v795_v10 = vpop.eup %794  ;;  %v484_v12 = vadd.f32 %v1072_v44, %v460_v9  ;;  %v462_v13 = vmul.f32 %v1050_v56, %v438_v18  ;;  %v377_v62 = vmax.f32 %v360_v59, 0.0  ;;  %v391_v57 = vsub.f32 %v901_v20, %v1033_v36 }
  0xe8   : > { %v797_v14 = vpop.eup %796  ;;  %762 = vst [vmem:[%s1093_s25 + $0x10] sm:$0xff] %v727_v21   ;;  %v485_v63 = vadd.f32 %v1072_v44, %v461_v32  ;;  %v439_v54 = vmul.f32 %v795_v10, %v388_v52  ;;  %804 = vrsqrt.f32 %v410_v4  ;;  %v378_v33 = vmax.f32 %v361_v6, 0.0 }
  0xe9   : > { %v440_v48 = vmul.f32 %v797_v14, %v389_v35  ;;  %v411_v58 = vadd.f32 1e-05, %v377_v62  ;;  %v486_v39 = vadd.f32 %v1072_v44, %v462_v13  ;;  %v392_v24 = vsub.f32 %v899_v19, %v1030_v1 }
  0xea   : > { %v732_v3 = vpack.c.bf16 %v485_v63, %v484_v12  ;;  %v463_v31 = vmul.f32 %v1050_v56, %v439_v54  ;;  %v412_v38 = vadd.f32 1e-05, %v378_v33  ;;  %v393_v26 = vsub.f32 %v908_v23, %v1045_v46 }
  0xeb   : > { %806 = vrsqrt.f32 %v411_v58  ;;  %v464_v15 = vmul.f32 %v1050_v56, %v440_v48  ;;  %v394_v5 = vsub.f32 %v906_v22, %v1036_v27  ;;  %v395_v23 = vsub.f32 %v913_v25, %v1067_v37 }
  0xec   : > { %v799_v45 = vpop.eup %798  ;;  %763 = vst [vmem:[%s1093_s25 + $0x18] sm:$0xff] %v732_v3   ;;  %v487_v55 = vadd.f32 %v1072_v44, %v463_v31  ;;  %808 = vrsqrt.f32 %v412_v38 }
  0xed   : > { %v801_v41 = vpop.eup %800  ;;  %v441_v8 = vmul.f32 %v799_v45, %v390_v17  ;;  %v488_v53 = vadd.f32 %v1072_v44, %v464_v15 }
  0xee   : > { %v737_v16 = vpack.c.bf16 %v487_v55, %v486_v39  ;;  %v442_v29 = vmul.f32 %v801_v41, %v391_v57 }
  0xef   : > { %v803_v42 = vpop.eup %802  ;;  %v465_v61 = vmul.f32 %v1050_v56, %v441_v8 }
  0xf0   : > { %764 = vst [vmem:[%s1093_s25 + $0x20] sm:$0xff] %v737_v16   ;;  %v466_v20 = vmul.f32 %v1050_v56, %v442_v29  ;;  %v443_v36 = vmul.f32 %v803_v42, %v392_v24 }
  0xf1   : > { %v489_v49 = vadd.f32 %v1072_v44, %v465_v61 }
  0xf2   : > { %v805_v50 = vpop.eup %804  ;;  %v467_v19 = vmul.f32 %v1050_v56, %v443_v36  ;;  %v490_v0 = vadd.f32 %v1072_v44, %v466_v20 }
  0xf3   : > { %v742_v1 = vpack.c.bf16 %v489_v49, %v488_v53  ;;  %v444_v30 = vmul.f32 %v805_v50, %v393_v26 }
  0xf4   : > { %v491_v34 = vadd.f32 %v1072_v44, %v467_v19 }
  0xf5   : > { %v807_v7 = vpop.eup %806  ;;  %765 = vst [vmem:[%s1093_s25 + $0x28] sm:$0xff] %v742_v1   ;;  %v468_v40 = vmul.f32 %v1050_v56, %v444_v30 }
  0xf6   : > { %v809_v46 = vpop.eup %808  ;;  %v747_v9 = vpack.c.bf16 %v491_v34, %v490_v0  ;;  %v445_v47 = vmul.f32 %v807_v7, %v394_v5 }
  0xf7   : > { %v446_v51 = vmul.f32 %v809_v46, %v395_v23  ;;  %v492_v11 = vadd.f32 %v1072_v44, %v468_v40 }
  0xf8   : > { %766 = vst [vmem:[%s1093_s25 + $0x30] sm:$0xff] %v747_v9   ;;  %v469_v22 = vmul.f32 %v1050_v56, %v445_v47 }
  0xf9   : > { %v470_v27 = vmul.f32 %v1050_v56, %v446_v51 }
  0xfa   : > { %v493_v43 = vadd.f32 %v1072_v44, %v469_v22 }
  0xfb   : > { %v494_v28 = vadd.f32 %v1072_v44, %v470_v27 }
  0xfc   : > { %v752_v25 = vpack.c.bf16 %v493_v43, %v492_v11 }
  0xfd   : > { %v681_v37 = vpack.c.bf16 %v494_v28, %v494_v28 }
  0xfe   : > { %767 = vst [vmem:[%s1093_s25 + $0x38] sm:$0xff] %v752_v25  }
  0xff   : > { %580 = vst [vmem:[%s1093_s25 + $0x40] sm:$0xf] %v681_v37 }
 0x100 PF: > { %s13_s12 = sadd.s32 1, %s816_s12  }
 0x101   : > { %p10_p4 = scmp.ge.s32.totalorder %s13_s12, 4  }
 0x103   :  { %12 = sbr.rel (!%p10_p4) target bundleno = 1 (0x1), region = 62 }

// kernel: clip_forward.6
= control target key start
LH: loop header
LB: loop body
LE: loop exit
PB: predicated region body
PF: predicated region fallthrough
CT: control target
= control target key end

     0   :  { %s1250_s1 = inlined_call_operand.vmem [shape: bf16[128,128], index: 1, kind: input, shape index: {}]   ;;  %s1251_s0 = inlined_call_operand.vmem [shape: bf16[128,128], index: 0, kind: input, shape index: {}]   ;;  %s1252_s2 = inlined_call_operand.vmem [shape: f32[1,128], index: 2, kind: input, shape index: {}, may-alias: {2,4}]   ;;  %s1253_s3 = inlined_call_operand.vmem [shape: f32[1,128], index: 3, kind: input, shape index: {}]   ;;  %s1254_s4 = inlined_call_operand.vmem [shape: f32[1,128], index: 4, kind: input, shape index: {}, may-alias: {2,4}]   ;;  %s1255_s5 = inlined_call_operand.vmem [shape: bf16[128,128], index: 5, kind: output, shape index: {}]  }
   0x1   :  { %v873_v0 = vld [vmem:[%s1250_s1] sm:$0xff]   ;;  %v874_v1 = vld [vmem:[%s1250_s1 + $0x8] sm:$0xff]   ;;  %v875_v2 = vld [vmem:[%s1250_s1 + $0x10] sm:$0xff]  }
   0x2   :  { %825 = vmatprep.subr.bf16.mxu0 %v873_v0  ;;  %857 = vmatprep.subr.bf16.mxu1 %v873_v0  ;;  %v876_v3 = vld [vmem:[%s1250_s1 + $0x18] sm:$0xff]   ;;  %v881_v4 = vld [vmem:[%s1251_s0] sm:$0xff]   ;;  %v878_v7 = vld [vmem:[%s1250_s1 + $0x28] sm:$0xff]  }
   0x3   :  { %826 = vmatpush3.bf16.msra.mxu0 %v873_v0  ;;  %865 = vmatpush3.bf16.msra.mxu1 %v873_v0  ;;  %v882_v5 = vld [vmem:[%s1251_s0 + $0x20] sm:$0xff]   ;;  %v879_v8 = vld [vmem:[%s1250_s1 + $0x30] sm:$0xff]   ;;  %v880_v9 = vld [vmem:[%s1250_s1 + $0x38] sm:$0xff]  }
   0x4   :  { %827 = vmatprep.subr.bf16.mxu0 %v874_v1  ;;  %858 = vmatprep.subr.bf16.mxu1 %v874_v1  ;;  %v877_v6 = vld [vmem:[%s1250_s1 + $0x20] sm:$0xff]   ;;  %v883_v10 = vld [vmem:[%s1251_s0 + $0x8] sm:$0xff]   ;;  %v885_v12 = vld [vmem:[%s1251_s0 + $0x10] sm:$0xff]  }
   0x5   :  { %841 = vmatprep.mubr.bf16.mxu0 %v881_v4  ;;  %849 = vmatprep.mubr.bf16.mxu1 %v882_v5  ;;  %v884_v11 = vld [vmem:[%s1251_s0 + $0x28] sm:$0xff]   ;;  %v887_v13 = vld [vmem:[%s1251_s0 + $0x30] sm:$0xff]   ;;  %v886_v14 = vld [vmem:[%s1251_s0 + $0x18] sm:$0xff]  }
   0x6   :  { %v888_v15 = vld [vmem:[%s1251_s0 + $0x38] sm:$0xff]   ;;  %v727_v16 = vld [vmem:[%s1252_s2] ss:$0 sm:$0xff] }
   0x7   :  { %828 = vmatpush3.bf16.msra.mxu0 %v874_v1  ;;  %866 = vmatpush3.bf16.msra.mxu1 %v874_v1 }
   0x8   :  { %829 = vmatprep.subr.bf16.mxu0 %v875_v2  ;;  %859 = vmatprep.subr.bf16.mxu1 %v875_v2 }
   0xb   :  { %830 = vmatpush3.bf16.msra.mxu0 %v875_v2  ;;  %867 = vmatpush3.bf16.msra.mxu1 %v875_v2 }
   0xc   :  { %831 = vmatprep.subr.bf16.mxu0 %v876_v3  ;;  %860 = vmatprep.subr.bf16.mxu1 %v876_v3 }
   0xf   :  { %832 = vmatpush3.bf16.msra.mxu0 %v876_v3  ;;  %868 = vmatpush3.bf16.msra.mxu1 %v876_v3 }
  0x10   :  { %833 = vmatprep.subr.bf16.mxu0 %v877_v6  ;;  %861 = vmatprep.subr.bf16.mxu1 %v877_v6 }
  0x13   :  { %834 = vmatpush3.bf16.msra.mxu0 %v877_v6  ;;  %869 = vmatpush3.bf16.msra.mxu1 %v877_v6 }
  0x14   :  { %835 = vmatprep.subr.bf16.mxu0 %v878_v7  ;;  %862 = vmatprep.subr.bf16.mxu1 %v878_v7 }
  0x17   :  { %836 = vmatpush3.bf16.msra.mxu0 %v878_v7  ;;  %870 = vmatpush3.bf16.msra.mxu1 %v878_v7 }
  0x18   :  { %837 = vmatprep.subr.bf16.mxu0 %v879_v8  ;;  %863 = vmatprep.subr.bf16.mxu1 %v879_v8 }
  0x1b   :  { %838 = vmatpush3.bf16.msra.mxu0 %v879_v8  ;;  %871 = vmatpush3.bf16.msra.mxu1 %v879_v8 }
  0x1c   :  { %839 = vmatprep.subr.bf16.mxu0 %v880_v9  ;;  %864 = vmatprep.subr.bf16.mxu1 %v880_v9 }
  0x1f   :  { %840 = vmatpush3.bf16.msra.mxu0 %v880_v9  ;;  %872 = vmatpush3.bf16.msra.mxu1 %v880_v9 }
  0x22   :  { %842 = vmatmul.mubr.bf16.vlgmr.msra.gmra.mrb[0].mxu0 %v883_v10  ;;  %850 = vmatmul.mubr.bf16.vlgmr.msra.gmra.mrb[0].mxu1 %v884_v11 }
  0x23   :  { %845 = vmatprep.mubr.bf16.mxu0 %v885_v12  ;;  %853 = vmatprep.mubr.bf16.mxu1 %v887_v13 }
  0x2a   :  { %846 = vmatmul.mubr.bf16.gmra.mrb[4].mxu0 %v886_v14  ;;  %854 = vmatmul.mubr.bf16.gmra.mrb[4].mxu1 %v888_v15 }
  0xf5   :  { %v843_v17 = vpop.f32.mrb[0].mxu0  ;;  %v851_v18 = vpop.f32.mrb[0].mxu1 }
  0xf6   :  { %v1002_v19 = vadd.f32 %v843_v17, %v727_v16  ;;  %v1004_v20 = vadd.f32 %v851_v18, %v727_v16  ;;  %v219_v21 = vpop.f32.mrb[1].mxu0  ;;  %v251_v22 = vpop.f32.mrb[1].mxu1 }
  0xf7   :  { %v844_v23 = vpop.f32.mrb[2].mxu0  ;;  %v852_v24 = vpop.f32.mrb[2].mxu1  ;;  %v1008_v27 = vadd.f32 %v727_v16, %v219_v21  ;;  %v1014_v31 = vadd.f32 %v727_v16, %v251_v22 }
  0xf8   :  { %376 = vadd.xlane.f32.xlu0 %v1004_v20  ;;  %v254_v25 = vpop.f32.mrb[3].mxu1  ;;  %360 = vadd.xlane.f32.xlu1 %v1002_v19  ;;  %v222_v26 = vpop.f32.mrb[3].mxu0  ;;  %v1010_v28 = vadd.f32 %v844_v23, %v727_v16  ;;  %v1016_v32 = vadd.f32 %v852_v24, %v727_v16  ;;  %v407_v40 = vmul.f32 %v1002_v19, %v1002_v19 }
  0xf9   :  { %v1020_v39 = vadd.f32 %v727_v16, %v254_v25  ;;  %v415_v41 = vmul.f32 %v1004_v20, %v1004_v20  ;;  %v1029_v43 = vadd.f32 %v727_v16, %v222_v26  ;;  %v405_v45 = vmul.f32 %v1008_v27, %v1008_v27 }
  0xfa   :  { %v408_v42 = vmul.f32 %v1010_v28, %v1010_v28  ;;  %v416_v44 = vmul.f32 %v1016_v32, %v1016_v32  ;;  %v413_v47 = vmul.f32 %v1014_v31, %v1014_v31 }
  0xfb   :  { %v406_v46 = vmul.f32 %v1029_v43, %v1029_v43  ;;  %v414_v48 = vmul.f32 %v1020_v39, %v1020_v39 }
  0xfc   :  { %356 = vadd.xlane.f32.xlu0 %v1008_v27  ;;  %362 = vadd.xlane.f32.xlu1 %v1010_v28 }
  0xfd   :  { %v847_v29 = vpop.f32.mrb[4].mxu0  ;;  %v855_v30 = vpop.f32.mrb[4].mxu1 }
  0xfe   :  { %v235_v33 = vpop.f32.mrb[5].mxu0  ;;  %v267_v34 = vpop.f32.mrb[5].mxu1  ;;  %v1042_v49 = vadd.f32 %v847_v29, %v727_v16  ;;  %v1048_v51 = vadd.f32 %v855_v30, %v727_v16 }
  0xff   :  { %v848_v35 = vpop.f32.mrb[6].mxu0  ;;  %v856_v36 = vpop.f32.mrb[6].mxu1  ;;  %v1054_v53 = vadd.f32 %v727_v16, %v235_v33  ;;  %v1060_v55 = vadd.f32 %v727_v16, %v267_v34 }
 0x100   :  { %372 = vadd.xlane.f32.xlu0 %v1014_v31  ;;  %378 = vadd.xlane.f32.xlu1 %v1016_v32  ;;  %v238_v37 = vpop.f32.mrb[7].mxu0  ;;  %v270_v38 = vpop.f32.mrb[7].mxu1  ;;  %v1044_v50 = vadd.f32 %v848_v35, %v727_v16  ;;  %v1050_v52 = vadd.f32 %v856_v36, %v727_v16  ;;  %v411_v57 = vmul.f32 %v1042_v49, %v1042_v49 }
 0x101   :  { %v1056_v54 = vadd.f32 %v727_v16, %v238_v37  ;;  %v1062_v56 = vadd.f32 %v727_v16, %v270_v38  ;;  %v409_v59 = vmul.f32 %v1054_v53, %v1054_v53  ;;  %v417_v61 = vmul.f32 %v1060_v55, %v1060_v55 }
 0x102   :  { %v412_v58 = vmul.f32 %v1044_v50, %v1044_v50  ;;  %v419_v63 = vmul.f32 %v1048_v51, %v1048_v51  ;;  %v420_v0 = vmul.f32 %v1050_v52, %v1050_v52 }
 0x103   :  { %v410_v60 = vmul.f32 %v1056_v54, %v1056_v54  ;;  %v418_v62 = vmul.f32 %v1062_v56, %v1062_v56 }
 0x104   :  { %425 = vadd.xlane.f32.xlu0 %v407_v40  ;;  %374 = vadd.xlane.f32.xlu1 %v1020_v39 }
 0x108   :  { %441 = vadd.xlane.f32.xlu0 %v415_v41  ;;  %427 = vadd.xlane.f32.xlu1 %v408_v42 }
 0x10c   :  { %443 = vadd.xlane.f32.xlu1 %v416_v44  ;;  %358 = vadd.xlane.f32.xlu0 %v1029_v43 }
 0x110   :  { %421 = vadd.xlane.f32.xlu0 %v405_v45  ;;  %423 = vadd.xlane.f32.xlu1 %v406_v46 }
 0x114   :  { %437 = vadd.xlane.f32.xlu0 %v413_v47  ;;  %439 = vadd.xlane.f32.xlu1 %v414_v48 }
 0x118   :  { %368 = vadd.xlane.f32.xlu0 %v1042_v49  ;;  %370 = vadd.xlane.f32.xlu1 %v1044_v50 }
 0x11c   :  { %384 = vadd.xlane.f32.xlu0 %v1048_v51  ;;  %386 = vadd.xlane.f32.xlu1 %v1050_v52 }
 0x120   :  { %364 = vadd.xlane.f32.xlu0 %v1054_v53  ;;  %366 = vadd.xlane.f32.xlu1 %v1056_v54 }
 0x124   :  { %380 = vadd.xlane.f32.xlu0 %v1060_v55  ;;  %382 = vadd.xlane.f32.xlu1 %v1062_v56 }
 0x128   :  { %433 = vadd.xlane.f32.xlu0 %v411_v57  ;;  %435 = vadd.xlane.f32.xlu1 %v412_v58 }
 0x12c   :  { %429 = vadd.xlane.f32.xlu0 %v409_v59  ;;  %431 = vadd.xlane.f32.xlu1 %v410_v60 }
 0x130   :  { %445 = vadd.xlane.f32.xlu0 %v417_v61  ;;  %447 = vadd.xlane.f32.xlu1 %v418_v62 }
 0x134   :  { %449 = vadd.xlane.f32.xlu0 %v419_v63  ;;  %451 = vadd.xlane.f32.xlu1 %v420_v0 }
 0x185   :  { %v377_v1 = vpop.xlane.xlu0 %376  ;;  %v361_v2 = vpop.xlane.xlu1 %360 }
 0x186   :  { %v1082_v7 = vmul.f32 0.0078125, %v361_v2  ;;  %v1084_v8 = vmul.f32 0.0078125, %v377_v1 }
 0x188   :  { %v471_v11 = vmul.f32 %v1082_v7, %v1082_v7  ;;  %v479_v15 = vmul.f32 %v1084_v8, %v1084_v8 }
 0x189   :  { %v357_v3 = vpop.xlane.xlu0 %356  ;;  %v363_v4 = vpop.xlane.xlu1 %362 }
 0x18a   :  { %v1088_v12 = vmul.f32 0.0078125, %v363_v4  ;;  %v1096_v30 = vmul.f32 0.0078125, %v357_v3 }
 0x18c   :  { %v472_v21 = vmul.f32 %v1088_v12, %v1088_v12  ;;  %v469_v45 = vmul.f32 %v1096_v30, %v1096_v30 }
 0x18d   :  { %v373_v5 = vpop.xlane.xlu0 %372  ;;  %v379_v6 = vpop.xlane.xlu1 %378 }
 0x18e   :  { %v1092_v16 = vmul.f32 0.0078125, %v379_v6  ;;  %v1104_v46 = vmul.f32 0.0078125, %v373_v5 }
 0x190   :  { %v480_v33 = vmul.f32 %v1092_v16, %v1092_v16  ;;  %v477_v1 = vmul.f32 %v1104_v46, %v1104_v46 }
 0x191   :  { %v426_v9 = vpop.xlane.xlu0 %425  ;;  %v375_v10 = vpop.xlane.xlu1 %374 }
 0x192   :  { %v455_v13 = vmul.f32 0.0078125, %v426_v9  ;;  %v1108_v61 = vmul.f32 0.0078125, %v375_v10  ;;  %v519_v10 = vsub.f32 %v1002_v19, %v1082_v7  ;;  %v520_v7 = vsub.f32 %v1010_v28, %v1088_v12 }
 0x194   :  { %v487_v14 = vsub.f32 %v455_v13, %v471_v11  ;;  %v478_v9 = vmul.f32 %v1108_v61, %v1108_v61 }
 0x195   :  { %v442_v17 = vpop.xlane.xlu0 %441  ;;  %v428_v18 = vpop.xlane.xlu1 %427 }
 0x196   :  { %v503_v22 = vmax.f32 %v487_v14, 0.0  ;;  %v463_v23 = vmul.f32 0.0078125, %v442_v17  ;;  %v456_v24 = vmul.f32 0.0078125, %v428_v18 }
 0x198   :  { %v535_v25 = vadd.f32 1e-05, %v503_v22  ;;  %v495_v26 = vsub.f32 %v463_v23, %v479_v15  ;;  %v488_v29 = vsub.f32 %v456_v24, %v472_v21 }
 0x199   :  { %v444_v34 = vpop.xlane.xlu1 %443  ;;  %v359_v35 = vpop.xlane.xlu0 %358 }
 0x19a   :  { %889 = vrsqrt.f32 %v535_v25  ;;  %v511_v36 = vmax.f32 %v495_v26, 0.0  ;;  %v504_v37 = vmax.f32 %v488_v29, 0.0  ;;  %v464_v38 = vmul.f32 0.0078125, %v444_v34  ;;  %v1121_v26 = vld [vmem:[%s1253_s3] ss:$0 sm:$0xff] }
 0x19b   :  { %v1100_v40 = vmul.f32 0.0078125, %v359_v35  ;;  %v527_v25 = vsub.f32 %v1004_v20, %v1084_v8 }
 0x19c   :  { %v543_v41 = vadd.f32 1e-05, %v511_v36  ;;  %v536_v42 = vadd.f32 1e-05, %v504_v37  ;;  %v496_v44 = vsub.f32 %v464_v38, %v480_v33 }
 0x19d   :  { %v470_v47 = vmul.f32 %v1100_v40, %v1100_v40  ;;  %v422_v48 = vpop.xlane.xlu0 %421  ;;  %v424_v57 = vpop.xlane.xlu1 %423 }
 0x19e   :  { %891 = vrsqrt.f32 %v543_v41  ;;  %v512_v58 = vmax.f32 %v496_v44, 0.0  ;;  %v453_v59 = vmul.f32 0.0078125, %v422_v48  ;;  %v454_v60 = vmul.f32 0.0078125, %v424_v57 }
 0x19f   :  { %893 = vrsqrt.f32 %v536_v42  ;;  %v528_v41 = vsub.f32 %v1016_v32, %v1092_v16  ;;  %v1135_v42 = vld [vmem:[%s1254_s4] ss:$0 sm:$0xff]  ;;  %v517_v32 = vsub.f32 %v1008_v27, %v1096_v30 }
 0x1a0   :  { %v544_v62 = vadd.f32 1e-05, %v512_v58  ;;  %v485_v63 = vsub.f32 %v453_v59, %v469_v45  ;;  %v486_v0 = vsub.f32 %v454_v60, %v470_v47 }
 0x1a1   :  { %v438_v2 = vpop.xlane.xlu0 %437  ;;  %v440_v3 = vpop.xlane.xlu1 %439 }
 0x1a2   :  { %895 = vrsqrt.f32 %v544_v62  ;;  %v501_v4 = vmax.f32 %v485_v63, 0.0  ;;  %v502_v5 = vmax.f32 %v486_v0, 0.0  ;;  %v461_v6 = vmul.f32 0.0078125, %v438_v2 }
 0x1a3   :  { %v462_v11 = vmul.f32 0.0078125, %v440_v3  ;;  %v518_v62 = vsub.f32 %v1029_v43, %v1100_v40  ;;  %v525_v43 = vsub.f32 %v1014_v31, %v1104_v46 }
 0x1a4   :  { %v890_v13 = vpop.eup %889  ;;  %v533_v14 = vadd.f32 1e-05, %v501_v4  ;;  %v534_v15 = vadd.f32 1e-05, %v502_v5  ;;  %v493_v17 = vsub.f32 %v461_v6, %v477_v1 }
 0x1a5   :  { %v494_v18 = vsub.f32 %v462_v11, %v478_v9  ;;  %v369_v21 = vpop.xlane.xlu0 %368  ;;  %v371_v22 = vpop.xlane.xlu1 %370  ;;  %v567_v23 = vmul.f32 %v890_v13, %v519_v10  ;;  %v526_v11 = vsub.f32 %v1020_v39, %v1108_v61 }
 0x1a6   :  { %897 = vrsqrt.f32 %v533_v14  ;;  %v509_v24 = vmax.f32 %v493_v17, 0.0  ;;  %v1146_v63 = vmul.f32 0.0078125, %v369_v21  ;;  %v1150_v4 = vmul.f32 0.0078125, %v371_v22 }
 0x1a7   :  { %899 = vrsqrt.f32 %v534_v15  ;;  %v510_v29 = vmax.f32 %v494_v18, 0.0  ;;  %v590_v20 = vmul.f32 %v1121_v26, %v567_v23 }
 0x1a8   :  { %v892_v19 = vpop.eup %891  ;;  %v541_v33 = vadd.f32 1e-05, %v509_v24  ;;  %v475_v10 = vmul.f32 %v1146_v63, %v1146_v63  ;;  %v476_v46 = vmul.f32 %v1150_v4, %v1150_v4 }
 0x1a9   :  { %v894_v34 = vpop.eup %893  ;;  %v575_v35 = vmul.f32 %v892_v19, %v527_v25  ;;  %v542_v36 = vadd.f32 1e-05, %v510_v29  ;;  %v1125_v37 = vpop.xlane.xlu0 %384  ;;  %v613_v57 = vadd.f32 %v1135_v42, %v590_v20 }
 0x1aa   :  { %v1127_v38 = vpop.xlane.xlu1 %386  ;;  %v568_v8 = vmul.f32 %v894_v34, %v520_v7  ;;  %901 = vrsqrt.f32 %v541_v33 }
 0x1ab   :  { %903 = vrsqrt.f32 %v542_v36  ;;  %v598_v44 = vmul.f32 %v1121_v26, %v575_v35 }
 0x1ac   :  { %v896_v28 = vpop.eup %895  ;;  %v591_v12 = vmul.f32 %v1121_v26, %v568_v8 }
 0x1ad   :  { %v576_v45 = vmul.f32 %v896_v28, %v528_v41  ;;  %v365_v47 = vpop.xlane.xlu0 %364  ;;  %v621_v1 = vadd.f32 %v1135_v42, %v598_v44 }
 0x1ae   :  { %v367_v48 = vpop.xlane.xlu1 %366  ;;  %v614_v58 = vadd.f32 %v1135_v42, %v591_v12  ;;  %v1169_v17 = vmul.f32 0.0078125, %v365_v47 }
 0x1af   :  { %v599_v16 = vmul.f32 %v1121_v26, %v576_v45  ;;  %v1173_v25 = vmul.f32 0.0078125, %v367_v48 }
 0x1b0   :  { %v898_v59 = vpop.eup %897  ;;  %v770_v60 = vpack.c.bf16 %v614_v58, %v613_v57  ;;  %v473_v35 = vmul.f32 %v1169_v17, %v1169_v17 }
 0x1b1   :  { %v900_v0 = vpop.eup %899  ;;  %v622_v2 = vadd.f32 %v1135_v42, %v599_v16  ;;  %v565_v3 = vmul.f32 %v898_v59, %v517_v32  ;;  %v381_v5 = vpop.xlane.xlu0 %380  ;;  %v474_v47 = vmul.f32 %v1173_v25, %v1173_v25  ;;  %v1190_v59 = vmul.f32 0.0078125, %v1125_v37 }
 0x1b2   :  { %v383_v6 = vpop.xlane.xlu1 %382  ;;  %802 = vst [vmem:[%s1255_s5 + $0x8] sm:$0xff] %v770_v60   ;;  %v566_v27 = vmul.f32 %v900_v0, %v518_v62  ;;  %v1179_v36 = vmul.f32 0.0078125, %v381_v5  ;;  %v1200_v37 = vmul.f32 0.0078125, %v1127_v38 }
 0x1b3   :  { %v790_v30 = vpack.c.bf16 %v622_v2, %v621_v1  ;;  %v588_v40 = vmul.f32 %v1121_v26, %v565_v3  ;;  %v1181_v20 = vmul.f32 0.0078125, %v383_v6 }
 0x1b4   :  { %v902_v9 = vpop.eup %901  ;;  %v589_v13 = vmul.f32 %v1121_v26, %v566_v27  ;;  %v481_v60 = vmul.f32 %v1179_v36, %v1179_v36 }
 0x1b5   :  { %v904_v14 = vpop.eup %903  ;;  %806 = vst [vmem:[%s1255_s5 + $0x28] sm:$0xff] %v790_v30   ;;  %v611_v15 = vadd.f32 %v1135_v42, %v588_v40  ;;  %v573_v31 = vmul.f32 %v902_v9, %v525_v43  ;;  %v434_v18 = vpop.xlane.xlu0 %433  ;;  %v482_v62 = vmul.f32 %v1181_v20, %v1181_v20  ;;  %v483_v9 = vmul.f32 %v1190_v59, %v1190_v59 }
 0x1b6   :  { %v436_v39 = vpop.xlane.xlu1 %435  ;;  %v612_v61 = vadd.f32 %v1135_v42, %v589_v13  ;;  %v574_v21 = vmul.f32 %v904_v14, %v526_v11  ;;  %v459_v22 = vmul.f32 0.0078125, %v434_v18 }
 0x1b7   :  { %v460_v23 = vmul.f32 0.0078125, %v436_v39  ;;  %v596_v24 = vmul.f32 %v1121_v26, %v573_v31 }
 0x1b8   :  { %v765_v29 = vpack.c.bf16 %v612_v61, %v611_v15  ;;  %v597_v19 = vmul.f32 %v1121_v26, %v574_v21  ;;  %v491_v7 = vsub.f32 %v459_v22, %v475_v10 }
 0x1b9   :  { %v492_v33 = vsub.f32 %v460_v23, %v476_v46  ;;  %v619_v34 = vadd.f32 %v1135_v42, %v596_v24  ;;  %v430_v8 = vpop.xlane.xlu0 %429  ;;  %v484_v46 = vmul.f32 %v1200_v37, %v1200_v37  ;;  %v523_v23 = vsub.f32 %v1042_v49, %v1146_v63 }
 0x1ba   :  { %v432_v41 = vpop.xlane.xlu1 %431  ;;  %766 = vst [vmem:[%s1255_s5] sm:$0xff] %v765_v29   ;;  %v620_v28 = vadd.f32 %v1135_v42, %v597_v19  ;;  %v507_v12 = vmax.f32 %v491_v7, 0.0  ;;  %v457_v45 = vmul.f32 0.0078125, %v430_v8  ;;  %v524_v19 = vsub.f32 %v1044_v50, %v1150_v4 }
 0x1bb   :  { %v508_v44 = vmax.f32 %v492_v33, 0.0  ;;  %v458_v48 = vmul.f32 0.0078125, %v432_v41  ;;  %v521_v41 = vsub.f32 %v1054_v53, %v1169_v17  ;;  %v522_v49 = vsub.f32 %v1056_v54, %v1173_v25 }
 0x1bc   :  { %v785_v57 = vpack.c.bf16 %v620_v28, %v619_v34  ;;  %v539_v58 = vadd.f32 1e-05, %v507_v12  ;;  %v489_v16 = vsub.f32 %v457_v45, %v473_v35 }
 0x1bd   :  { %v540_v32 = vadd.f32 1e-05, %v508_v44  ;;  %v490_v0 = vsub.f32 %v458_v48, %v474_v47  ;;  %v446_v1 = vpop.xlane.xlu0 %445  ;;  %v529_v48 = vsub.f32 %v1060_v55, %v1179_v36  ;;  %v531_v36 = vsub.f32 %v1048_v51, %v1190_v59 }
 0x1be   :  { %v448_v2 = vpop.xlane.xlu1 %447  ;;  %805 = vst [vmem:[%s1255_s5 + $0x20] sm:$0xff] %v785_v57   ;;  %905 = vrsqrt.f32 %v539_v58  ;;  %v505_v3 = vmax.f32 %v489_v16, 0.0  ;;  %v465_v5 = vmul.f32 0.0078125, %v446_v1  ;;  %v530_v57 = vsub.f32 %v1062_v56, %v1181_v20 }
 0x1bf   :  { %v466_v6 = vmul.f32 0.0078125, %v448_v2  ;;  %907 = vrsqrt.f32 %v540_v32  ;;  %v506_v27 = vmax.f32 %v490_v0, 0.0  ;;  %v532_v20 = vsub.f32 %v1050_v52, %v1200_v37 }
 0x1c0   :  { %v537_v43 = vadd.f32 1e-05, %v505_v3  ;;  %v497_v30 = vsub.f32 %v465_v5, %v481_v60 }
 0x1c1   :  { %v498_v40 = vsub.f32 %v466_v6, %v482_v62  ;;  %v538_v11 = vadd.f32 1e-05, %v506_v27  ;;  %v450_v13 = vpop.xlane.xlu0 %449 }
 0x1c2   :  { %v452_v10 = vpop.xlane.xlu1 %451  ;;  %909 = vrsqrt.f32 %v537_v43  ;;  %v513_v14 = vmax.f32 %v497_v30, 0.0  ;;  %v467_v31 = vmul.f32 0.0078125, %v450_v13 }
 0x1c3   :  { %v514_v15 = vmax.f32 %v498_v40, 0.0  ;;  %911 = vrsqrt.f32 %v538_v11  ;;  %v468_v38 = vmul.f32 0.0078125, %v452_v10 }
 0x1c4   :  { %v545_v18 = vadd.f32 1e-05, %v513_v14  ;;  %v499_v61 = vsub.f32 %v467_v31, %v483_v9 }
 0x1c5   :  { %v546_v39 = vadd.f32 1e-05, %v514_v15  ;;  %v500_v21 = vsub.f32 %v468_v38, %v484_v46 }
 0x1c6   :  { %913 = vrsqrt.f32 %v545_v18  ;;  %v515_v22 = vmax.f32 %v499_v61, 0.0 }
 0x1c7   :  { %915 = vrsqrt.f32 %v546_v39  ;;  %v516_v24 = vmax.f32 %v500_v21, 0.0 }
 0x1c8   :  { %v906_v29 = vpop.eup %905  ;;  %v547_v7 = vadd.f32 1e-05, %v515_v22 }
 0x1c9   :  { %v908_v33 = vpop.eup %907  ;;  %v571_v34 = vmul.f32 %v906_v29, %v523_v23  ;;  %v548_v35 = vadd.f32 1e-05, %v516_v24 }
 0x1ca   :  { %v572_v8 = vmul.f32 %v908_v33, %v524_v19  ;;  %917 = vrsqrt.f32 %v547_v7 }
 0x1cb   :  { %v594_v28 = vmul.f32 %v1121_v26, %v571_v34  ;;  %919 = vrsqrt.f32 %v548_v35 }
 0x1cc   :  { %v910_v12 = vpop.eup %909  ;;  %v595_v63 = vmul.f32 %v1121_v26, %v572_v8 }
 0x1cd   :  { %v912_v44 = vpop.eup %911  ;;  %v617_v50 = vadd.f32 %v1135_v42, %v594_v28  ;;  %v569_v4 = vmul.f32 %v910_v12, %v521_v41 }
 0x1ce   :  { %v618_v45 = vadd.f32 %v1135_v42, %v595_v63  ;;  %v570_v47 = vmul.f32 %v912_v44, %v522_v49 }
 0x1cf   :  { %v592_v53 = vmul.f32 %v1121_v26, %v569_v4 }
 0x1d0   :  { %v914_v17 = vpop.eup %913  ;;  %v780_v58 = vpack.c.bf16 %v618_v45, %v617_v50  ;;  %v593_v54 = vmul.f32 %v1121_v26, %v570_v47 }
 0x1d1   :  { %v916_v25 = vpop.eup %915  ;;  %v615_v32 = vadd.f32 %v1135_v42, %v592_v53  ;;  %v577_v16 = vmul.f32 %v914_v17, %v529_v48 }
 0x1d2   :  { %804 = vst [vmem:[%s1255_s5 + $0x18] sm:$0xff] %v780_v58   ;;  %v616_v60 = vadd.f32 %v1135_v42, %v593_v54  ;;  %v578_v55 = vmul.f32 %v916_v25, %v530_v57 }
 0x1d3   :  { %v600_v62 = vmul.f32 %v1121_v26, %v577_v16 }
 0x1d4   :  { %v918_v56 = vpop.eup %917  ;;  %v775_v0 = vpack.c.bf16 %v616_v60, %v615_v32  ;;  %v601_v1 = vmul.f32 %v1121_v26, %v578_v55 }
 0x1d5   :  { %v920_v2 = vpop.eup %919  ;;  %v623_v3 = vadd.f32 %v1135_v42, %v600_v62  ;;  %v579_v5 = vmul.f32 %v918_v56, %v531_v36 }
 0x1d6   :  { %803 = vst [vmem:[%s1255_s5 + $0x10] sm:$0xff] %v775_v0   ;;  %v624_v6 = vadd.f32 %v1135_v42, %v601_v1  ;;  %v580_v51 = vmul.f32 %v920_v2, %v532_v20 }
 0x1d7   :  { %v602_v59 = vmul.f32 %v1121_v26, %v579_v5 }
 0x1d8   :  { %v795_v27 = vpack.c.bf16 %v624_v6, %v623_v3  ;;  %v603_v43 = vmul.f32 %v1121_v26, %v580_v51 }
 0x1d9   :  { %v625_v52 = vadd.f32 %v1135_v42, %v602_v59 }
 0x1da   :  { %807 = vst [vmem:[%s1255_s5 + $0x30] sm:$0xff] %v795_v27   ;;  %v626_v37 = vadd.f32 %v1135_v42, %v603_v43 }
 0x1dc   :  { %v800_v30 = vpack.c.bf16 %v626_v37, %v625_v52 }
 0x1de   :  { %808 = vst [vmem:[%s1255_s5 + $0x38] sm:$0xff] %v800_v30  }

// kernel: clip_forward.7
= control target key start
LH: loop header
LB: loop body
LE: loop exit
PB: predicated region body
PF: predicated region fallthrough
CT: control target
= control target key end

     0   :  { %v653_v1 = vmov 0.0   ;;  %vm654_vm0 = vmmov 0   ;;  %s802_s0 = inlined_call_operand.vmem [shape: bf16[16,128], index: 0, kind: input, shape index: {}]   ;;  %s803_s1 = inlined_call_operand.vmem [shape: bf16[16,128], index: 1, kind: input, shape index: {}]   ;;  %s804_s2 = inlined_call_operand.vmem [shape: bf16[128,128], index: 2, kind: input, shape index: {}]   ;;  %s805_s3 = inlined_call_operand.vmem [shape: f32[1,128], index: 3, kind: input, shape index: {}, may-alias: {3,5}]   ;;  %s806_s4 = inlined_call_operand.vmem [shape: bf16[128,128], index: 4, kind: input, shape index: {}]   ;;  %s807_s5 = inlined_call_operand.vmem [shape: f32[1,128], index: 5, kind: input, shape index: {}, may-alias: {3,5}]   ;;  %s808_s6 = inlined_call_operand.<no memory space> [shape: f32[1], index: 6, kind: input, shape index: {}]   ;;  %s809_s7 = inlined_call_operand.hbm [shape: f32[1,1], index: 7, kind: output, shape index: {}]  }
   0x1   :  { %v587_v0 = vld [vmem:[%s804_s2] sm:$0xff]   ;;  %527 = vmatprep.subr.bf16.mxu0 %v653_v1  ;;  %547 = vmatprep.subr.bf16.mxu1 %v653_v1  ;;  %v589_v3 = vld [vmem:[%s804_s2 + $0x8] sm:$0xff]   ;;  %v591_v5 = vld [vmem:[%s804_s2 + $0x10] sm:$0xff]  }
   0x2   :  { %v588_v2 = vld [vmem:[%s806_s4] sm:$0xff]   ;;  %528 = vmatpush3.bf16.msra.mxu0 %v587_v0  ;;  %543 = vmatprep.mubr.msk.bf16.mxu0 %vm654_vm0, %v653_v1  ;;  %v590_v4 = vld [vmem:[%s806_s4 + $0x8] sm:$0xff]   ;;  %v592_v6 = vld [vmem:[%s806_s4 + $0x10] sm:$0xff]  }
   0x3   :  { %548 = vmatpush3.bf16.msra.mxu1 %v588_v2  ;;  %529 = vmatprep.subr.bf16.mxu0 %v653_v1  ;;  %v593_v7 = vld [vmem:[%s804_s2 + $0x18] sm:$0xff]   ;;  %v595_v9 = vld [vmem:[%s804_s2 + $0x20] sm:$0xff]   ;;  %v597_v11 = vld [vmem:[%s804_s2 + $0x28] sm:$0xff]  }
   0x4   :  { %549 = vmatprep.subr.bf16.mxu1 %v653_v1  ;;  %563 = vmatprep.mubr.msk.bf16.mxu1 %vm654_vm0, %v653_v1  ;;  %v594_v8 = vld [vmem:[%s806_s4 + $0x18] sm:$0xff]   ;;  %v596_v10 = vld [vmem:[%s806_s4 + $0x20] sm:$0xff]  }
   0x6   :  { %530 = vmatpush3.bf16.msra.mxu0 %v589_v3 }
   0x7   :  { %550 = vmatpush3.bf16.msra.mxu1 %v590_v4  ;;  %531 = vmatprep.subr.bf16.mxu0 %v653_v1 }
   0x8   :  { %551 = vmatprep.subr.bf16.mxu1 %v653_v1 }
   0xa   :  { %532 = vmatpush3.bf16.msra.mxu0 %v591_v5 }
   0xb   :  { %552 = vmatpush3.bf16.msra.mxu1 %v592_v6  ;;  %533 = vmatprep.subr.bf16.mxu0 %v653_v1 }
   0xc   :  { %553 = vmatprep.subr.bf16.mxu1 %v653_v1 }
   0xe   :  { %534 = vmatpush3.bf16.msra.mxu0 %v593_v7 }
   0xf   :  { %554 = vmatpush3.bf16.msra.mxu1 %v594_v8  ;;  %535 = vmatprep.subr.bf16.mxu0 %v653_v1 }
  0x10   :  { %555 = vmatprep.subr.bf16.mxu1 %v653_v1 }
  0x12   :  { %536 = vmatpush3.bf16.msra.mxu0 %v595_v9 }
  0x13   :  { %13 = vsyncpa [#allocation4], 0  ;;  %556 = vmatpush3.bf16.msra.mxu1 %v596_v10  ;;  %537 = vmatprep.subr.bf16.mxu0 %v653_v1  ;;  %v598_v12 = vld [vmem:[%s806_s4 + $0x28] sm:$0xff]   ;;  %v599_v13 = vld [vmem:[%s804_s2 + $0x30] sm:$0xff]   ;;  %v377_v59 = vlaneseq  ;;  %vm388_vm3 = vcmask 130048   ;;  %vm467_vm4 = vcmask 0  }
  0x14   :  { %557 = vmatprep.subr.bf16.mxu1 %v653_v1  ;;  %v600_v14 = vld [vmem:[%s806_s4 + $0x30] sm:$0xff]   ;;  %v601_v15 = vld [vmem:[%s804_s2 + $0x38] sm:$0xff]   ;;  %v603_v17 = vld [vmem:[%s802_s0] sm:$0xff]   ;;  %s655_s2 = smov 0.001  }
  0x15   :  { %v602_v16 = vld [vmem:[%s806_s4 + $0x38] sm:$0xff]   ;;  %v604_v18 = vld [vmem:[%s803_s1] sm:$0xff]   ;;  %s30_s16 = smax.f32 %s655_s2, %s808_s6  ;;  %s656_s4 = smov 0.5   ;;  %v378_v60 = vshrl.u32 %v377_v59, 7  ;;  %v381_v61 = vand.u32 127, %v377_v59 }
  0x16   :  { %538 = vmatpush3.bf16.msra.mxu0 %v597_v11  ;;  %s31_s17 = smin.f32 %s656_s4, %s30_s16  ;;  %v483_v21 = vld [vmem:[%s805_s3] ss:$0 sm:$0xff]  ;;  %s657_s6 = smov [#allocation3]  }
  0x17   :  { %558 = vmatpush3.bf16.msra.mxu1 %v598_v12  ;;  %539 = vmatprep.subr.bf16.mxu0 %v653_v1  ;;  %v32_v19 = vstv %s31_s17  ;;  %v493_v22 = vld [vmem:[%s807_s5] ss:$0 sm:$0xff]  ;;  %v379_v62 = vadd.s32 8, %v378_v60  ;;  %vm382_vm2 = vcmp.eq.s32.totalorder %v378_v60, %v381_v61  ;;  %s475_s20 = sshll.u32 %s657_s6, 4  ;;  %s476_s20 = int_to_ptr.vmem [resolvable:$true] %s475_s20 }
  0x18   :  { %559 = vmatprep.subr.bf16.mxu1 %v653_v1  ;;  %605 = vrcp.f32 %v32_v19  ;;  %v503_v0 = vsel %vm382_vm2, 1.0, %v653_v1  ;;  %s629_s21 = scalar_lea.vmem %s476_s20, 16  ;;  %s633_s22 = scalar_lea.vmem %s476_s20, 32 }
  0x19   :  { %vm383_vm1 = vcmp.eq.s32.totalorder %v379_v62, %v381_v61  ;;  %p630_p0 = scmp.ne.s32.totalorder %s476_s20, %s629_s21  ;;  %p634_p1 = scmp.lt.s32.totalorder %s476_s20, %s476_s20 }
  0x1a   :  { %540 = vmatpush3.bf16.msra.mxu0 %v599_v13  ;;  %v504_v63 = vsel %vm383_vm1, 1.0, %v653_v1  ;;  %p635_p2 = scmp.lt.s32.totalorder %s633_s22, %s629_s21 }
  0x1b   :  { %560 = vmatpush3.bf16.msra.mxu1 %v600_v14  ;;  %541 = vmatprep.subr.bf16.mxu0 %v653_v1 }
  0x1c   :  { %561 = vmatprep.subr.bf16.mxu1 %v653_v1  ;;  %p636_p3 = por %p635_p2, %p634_p1 }
  0x1e   :  { %542 = vmatpush3.bf16.msra.mxu0 %v601_v15  ;;  %p637_p4 = pnand %p636_p3, %p630_p0 }
  0x1f   :  { %562 = vmatpush3.bf16.msra.mxu1 %v602_v16 }
  0x21   :  { %544 = vmatmul.mubr.bf16.vlgmr.msra.gmra.mrb[0].mxu0 %v603_v17 }
  0x22   :  { %564 = vmatmul.mubr.bf16.vlgmr.msra.gmra.mrb[0].mxu1 %v604_v18  ;;  %v606_v20 = vpop.eup %605 }
  0x23   :  { %578 = vpush %v606_v20 }
  0x54   :  { %s579_s3 = spop %578 }
  0x55   :  { %v299_v48 = vstv %s579_s3 }
  0xf4   :  { %v148_v23 = vpop.f32.mrb[0].mxu0 }
  0xf5   :  { %v149_v24 = vadd.f32 %v483_v21, %v148_v23  ;;  %v268_v25 = vpop.f32.mrb[0].mxu1  ;;  %v545_v26 = vpop.f32.mrb[1].mxu0 }
  0xf6   :  { %v269_v27 = vadd.f32 %v493_v22, %v268_v25  ;;  %v565_v28 = vpop.f32.mrb[1].mxu1  ;;  %v151_v29 = vpop.f32.mrb[2].mxu0 }
  0xf7   :  { %v271_v30 = vpop.f32.mrb[2].mxu1  ;;  %v152_v31 = vadd.f32 %v483_v21, %v151_v29  ;;  %v275_v32 = vmul.f32 %v149_v24, %v149_v24  ;;  %v546_v33 = vpop.f32.mrb[3].mxu0 }
  0xf8   :  { %v272_v34 = vadd.f32 %v493_v22, %v271_v30  ;;  %v566_v35 = vpop.f32.mrb[3].mxu1  ;;  %v287_v36 = vmul.f32 %v269_v27, %v269_v27 }
  0xf9   :  { %277 = vadd.xlane.f32.xlu1 %v275_v32  ;;  %v276_v37 = vmul.f32 %v152_v31, %v152_v31 }
  0xfa   :  { %289 = vadd.xlane.f32.xlu0 %v287_v36  ;;  %v288_v38 = vmul.f32 %v272_v34, %v272_v34 }
  0xfd   :  { %279 = vadd.xlane.f32.xlu1 %v276_v37 }
  0xfe   :  { %291 = vadd.xlane.f32.xlu0 %v288_v38 }
 0x186   :  { %v278_v39 = vpop.xlane.xlu1 %277 }
 0x187   :  { %v290_v40 = vpop.xlane.xlu0 %289  ;;  %v281_v41 = vmax.f32 %v278_v39, 1e-24 }
 0x188   :  { %v293_v42 = vmax.f32 %v290_v40, 1e-24 }
 0x189   :  { %607 = vrsqrt.f32 %v281_v41 }
 0x18a   :  { %v280_v44 = vpop.xlane.xlu1 %279  ;;  %609 = vrsqrt.f32 %v293_v42 }
 0x18b   :  { %v292_v43 = vpop.xlane.xlu0 %291  ;;  %v282_v46 = vmax.f32 %v280_v44, 1e-24 }
 0x18c   :  { %v294_v45 = vmax.f32 %v292_v43, 1e-24 }
 0x18e   :  { %611 = vrsqrt.f32 %v294_v45 }
 0x18f   :  { %613 = vrsqrt.f32 %v282_v46 }
 0x193   :  { %v608_v47 = vpop.eup %607 }
 0x194   :  { %v285_v49 = vmul.f32 %v608_v47, %v149_v24  ;;  %v610_v50 = vpop.eup %609 }
 0x195   :  { %v297_v53 = vmul.f32 %v610_v50, %v269_v27 }
 0x196   :  { %v300_v51 = vmul.f32 %v299_v48, %v285_v49 }
 0x198   :  { %v612_v52 = vpop.eup %611  ;;  %571 = vmatprep.mubr.f32.mxu0 %v300_v51 }
 0x199   :  { %v298_v54 = vmul.f32 %v612_v52, %v272_v34  ;;  %v614_v56 = vpop.eup %613 }
 0x19a   :  { %v286_v57 = vmul.f32 %v614_v56, %v152_v31 }
 0x19b   :  { %v574_v55 = vpack.c.bf16 %v298_v54, %v297_v53 }
 0x19c   :  { %v301_v58 = vmul.f32 %v299_v48, %v286_v57 }
 0x19d   :  { %575 = vmatprep.subr.bf16.mxu0 %v574_v55 }
 0x19e   :  { %577 = vmatpush3.bf16.xpose.msra.mxu0 %v574_v55 }
 0x1a5   :  { %572 = vmatmul.mubr.f32.vlgmr.msra.gmra.mrb[4].mxu0 %v301_v58 }
 0x278   :  { %v573_v2 = vpop.f32.mrb[4].mxu0 }
 0x279   :  { %v368_v3 = vpop.f32.mrb[5].mxu0  ;;  %v392_v4 = vsel %vm388_vm3, %v573_v2, -inf  ;;  %v439_v5 = vmul.f32 %v573_v2, %v504_v63 }
 0x27a   :  { %v438_v6 = vmul.f32 %v503_v0, %v368_v3  ;;  %393 = vmax.xlane.f32.xlu1 %v392_v4  ;;  %v389_v7 = vsel %vm388_vm3, %v368_v3, -inf }
 0x27b   :  { %390 = vmax.xlane.f32.xlu0 %v389_v7  ;;  %v413_v8 = vmax.f32 %v389_v7, %v392_v4  ;;  %v441_v9 = vsel %vm388_vm3, %v439_v5, 0.0 }
 0x27c   :  { %v440_v10 = vsel %vm388_vm3, %v438_v6, 0.0 }
 0x27d   :  { %v414_v11 = vrot.slane %v413_v8, 4  ;;  %v442_v12 = vadd.f32 %v441_v9, %v440_v10 }
 0x27f   :  { %v415_v13 = vmax.f32 %v413_v8, %v414_v11  ;;  %443 = vadd.xlane.f32.xlu0 %v442_v12 }
 0x281   :  { %v416_v1 = vrot.slane %v415_v13, 2 }
 0x283   :  { %v417_v14 = vmax.f32 %v415_v13, %v416_v1 }
 0x285   :  { %v418_v15 = vrot.slane %v417_v14, 1 }
 0x287   :  { %v419_v16 = vmax.f32 %v417_v14, %v418_v15 }
 0x289   :  { %v420_v17 = vsub.f32 %v368_v3, %v419_v16  ;;  %v421_v18 = vsub.f32 %v573_v2, %v419_v16 }
 0x28b   :  { %v422_v19 = vmul.f32 1.442695, %v420_v17  ;;  %v424_v20 = vmul.f32 1.442695, %v421_v18 }
 0x28d   :  { %615 = vpow2.f32 %v422_v19 }
 0x28e   :  { %617 = vpow2.f32 %v424_v20 }
 0x297   :  { %v616_v21 = vpop.eup %615 }
 0x298   :  { %v618_v22 = vpop.eup %617  ;;  %v426_v23 = vsel %vm388_vm3, %v616_v21, 0.0 }
 0x299   :  { %v427_v24 = vsel %vm388_vm3, %v618_v22, 0.0 }
 0x29a   :  { %v428_v25 = vadd.f32 %v427_v24, %v426_v23 }
 0x29c   :  { %v429_v26 = vrot.slane %v428_v25, 4 }
 0x29e   :  { %v430_v27 = vadd.f32 %v429_v26, %v428_v25 }
 0x2a0   :  { %v431_v28 = vrot.slane %v430_v27, 2 }
 0x2a2   :  { %v432_v29 = vadd.f32 %v431_v28, %v430_v27 }
 0x2a4   :  { %v433_v30 = vrot.slane %v432_v29, 1 }
 0x2a6   :  { %v434_v31 = vadd.f32 %v433_v30, %v432_v29 }
 0x2a8   :  { %619 = vlog2.f32 %v434_v31 }
 0x2b2   :  { %v620_v32 = vpop.eup %619 }
 0x2b3   :  { %v436_v33 = vmul.f32 0.6931472, %v620_v32 }
 0x2b5   :  { %v437_v34 = vadd.f32 %v436_v33, %v419_v16 }
 0x2b7   :  { %v460_v52 = vsel %vm388_vm3, %v437_v34, 0.0 }
 0x307   :  { %v394_v35 = vpop.xlane.xlu1 %393 }
 0x308   :  { %v396_v36 = vsub.f32 %v573_v2, %v394_v35  ;;  %v391_v37 = vpop.xlane.xlu0 %390 }
 0x309   :  { %v395_v38 = vsub.f32 %v368_v3, %v391_v37 }
 0x30a   :  { %v399_v39 = vmul.f32 1.442695, %v396_v36 }
 0x30b   :  { %v397_v40 = vmul.f32 1.442695, %v395_v38 }
 0x30c   :  { %621 = vpow2.f32 %v399_v39  ;;  %v444_v41 = vpop.xlane.xlu0 %443 }
 0x30d   :  { %623 = vpow2.f32 %v397_v40  ;;  %v445_v42 = vrot.slane %v444_v41, 4 }
 0x30f   :  { %v446_v43 = vadd.f32 %v445_v42, %v444_v41 }
 0x311   :  { %v447_v44 = vrot.slane %v446_v43, 2 }
 0x313   :  { %v448_v45 = vadd.f32 %v447_v44, %v446_v43 }
 0x315   :  { %v449_v46 = vrot.slane %v448_v45, 1 }
 0x316   :  { %v622_v47 = vpop.eup %621 }
 0x317   :  { %v624_v48 = vpop.eup %623  ;;  %v404_v49 = vsel %vm388_vm3, %v622_v47, 0.0  ;;  %v450_v50 = vadd.f32 %v449_v46, %v448_v45 }
 0x318   :  { %405 = vadd.xlane.f32.xlu0 %v404_v49  ;;  %v401_v51 = vsel %vm388_vm3, %v624_v48, 0.0 }
 0x319   :  { %402 = vadd.xlane.f32.xlu1 %v401_v51  ;;  %580 = vpush %v450_v50 }
 0x31d   :  { %461 = vadd.xlane.f32.xlu1 %v460_v52 }
 0x34a   :  { %s581_s5 = spop %580 }
 0x34b   :  { %v452_v4 = vstv %s581_s5 }
 0x34c   :  { %v464_v7 = vmul.f32 2.0, %v452_v4 }
 0x3a5   :  { %v406_v53 = vpop.xlane.xlu0 %405 }
 0x3a6   :  { %625 = vlog2.f32 %v406_v53  ;;  %v403_v54 = vpop.xlane.xlu1 %402 }
 0x3a7   :  { %627 = vlog2.f32 %v403_v54 }
 0x3aa   :  { %v462_v6 = vpop.xlane.xlu1 %461 }
 0x3b0   :  { %v626_v55 = vpop.eup %625 }
 0x3b1   :  { %v628_v56 = vpop.eup %627  ;;  %v410_v57 = vmul.f32 0.6931472, %v626_v55 }
 0x3b2   :  { %v408_v58 = vmul.f32 0.6931472, %v628_v56 }
 0x3b3   :  { %v412_v59 = vadd.f32 %v410_v57, %v394_v35 }
 0x3b4   :  { %v411_v60 = vadd.f32 %v408_v58, %v391_v37 }
 0x3b6   :  { %v453_v61 = vadd.f32 %v412_v59, %v411_v60 }
 0x3b8   :  { %v454_v62 = vrot.slane %v453_v61, 4 }
 0x3ba   :  { %v455_v63 = vadd.f32 %v454_v62, %v453_v61 }
 0x3bc   :  { %v456_v0 = vrot.slane %v455_v63, 2 }
 0x3be   :  { %v457_v2 = vadd.f32 %v456_v0, %v455_v63 }
 0x3c0   :  { %v458_v3 = vrot.slane %v457_v2, 1 }
 0x3c2   :  { %v459_v5 = vadd.f32 %v458_v3, %v457_v2 }
 0x3c4   :  { %v463_v8 = vadd.f32 %v462_v6, %v459_v5 }
 0x3c6   :  { %v465_v9 = vsub.f32 %v463_v8, %v464_v7 }
 0x3c8   :  { %v466_v10 = vmul.f32 0.03125, %v465_v9 }
 0x3ca   :  { %468 = vst.msk [vmem:[#allocation3] sm:$0x1] %vm467_vm4, %v466_v10 }
 0x3cb   :  { %640 = shalt.err (!%p637_p4)
}
 0x3cc   :  { %s641_s25 = scalar_lea.hbm %s809_s7, 16 }
 0x3cd   :  { %p642_p5 = scmp.ne.s32.totalorder %s809_s7, %s641_s25  ;;  %p645_p6 = scmp.lt.u32.totalorder %s641_s25, %s809_s7 }
 0x3cf   :  { %p647_p7 = pnand %p645_p6, %p642_p5 }
 0x3d1   :  { %650 = shalt.err (!%p647_p7)
}
 0x3d2   :  { %478 = dma.vmem_to_hbm [thread:$0]  %s476_s20, 16, %s809_s7, [#allocation4]  }
 0x3d3   :  { %651 = dma.done.wait [#allocation4], 16  }
 0x3d4   :  { %652 = vsyncadd [#allocation4], 4294967280 }
 0x3d5   :  { %482 = vsyncpa [#allocation4], 1 }

</bundles_post_ra>
